<compile_context>
chip_gen: v6e
topology: v6e:2x2x1
jax: 0.10.0
libtpu: 0.0.40
codegen_flags: <defaults>
</compile_context>

<pallas_src>
import jax
import jax.numpy as jnp
import numpy as np
from jax import lax
from jax.experimental import pallas as pl
from jax.experimental.pallas import tpu as pltpu

# ---------------- model sizes (small, consistent with the module) ----------------
N_CATEGORIES = 8
INPUT_SIZE   = 32     # == output_size (one-hot letters in the original model)
HIDDEN_SIZE  = 32
OUTPUT_SIZE  = 32
BATCH        = 8      # fills the 8 sublanes of an f32 vreg (was 2)
SEQ_LEN      = 8      # number of recurrent steps folded into one kernel call
COMBINED     = N_CATEGORIES + INPUT_SIZE + HIDDEN_SIZE   # c2i / c2h input width (72)
FUSED_OUT    = OUTPUT_SIZE + HIDDEN_SIZE                 # width of [interm | hidden] (64)


# --------------------------------- kernel ---------------------------------------
def generator_seq_kernel(cat_ref, prev_out_seq_ref, h0_pad_ref,
                         w_cat_c_ref, w_cat_o_ref, w_cat_h_pad_ref, b_cat_ref,
                         w_i2o_ref, b_i2o_ref,
                         logp_ref, ih_final_ref,
                         ih_scratch):
    T = prev_out_seq_ref.shape[0]

    # Loop-invariant part of the fused c2i/c2h matmul: category @ [W_c2i|W_c2h] + bias.
    base = (jnp.dot(cat_ref[...], w_cat_c_ref[...],
                    preferred_element_type=jnp.float32)
            + b_cat_ref[...])                                        # [B, FUSED_OUT]

    # Recurrent state scratch holds the full fused activation [interm | hidden] so the
    # hidden half never has to be rebased to lane 0 between steps.
    ih_scratch[...] = h0_pad_ref[...]                                # [B, FUSED_OUT]

    def step(t, carry):
        # ih = cat@Wc + prev_out_t@Wo + hidden@Wh + b   (Wh row-block zero-padded to [64,64])
        ih = (base
              + jnp.dot(prev_out_seq_ref[t], w_cat_o_ref[...],
                        preferred_element_type=jnp.float32)
              + jnp.dot(ih_scratch[...], w_cat_h_pad_ref[...],
                        preferred_element_type=jnp.float32))         # [B, FUSED_OUT]

        # i2o(cat(interm, hidden)) -- `ih` already IS that concatenation.
        out = jnp.dot(ih, w_i2o_ref[...],
                      preferred_element_type=jnp.float32) + b_i2o_ref[...]   # [B, OUT]

        # TODO(synk): dropout implemented as identity (eval mode); training would use
        # pltpu.prng_seed + pltpu.stateful_bernoulli with 1/(1-p) rescaling.

        # Numerically stable log-softmax along features (dim=1), all f32.
        m = jnp.max(out, axis=1, keepdims=True)
        shifted = out - m
        lse = jnp.log(jnp.sum(jnp.exp(shifted), axis=1, keepdims=True))

        logp_ref[t] = shifted - lse
        ih_scratch[...] = ih
        return carry

    lax.fori_loop(0, T, step, 0, unroll=True)

    # Emit the full 64-lane fused activation; the wrapper slices the hidden half once.
    ih_final_ref[...] = ih_scratch[...]


# ----------------------- one-time parameter preparation --------------------------
def prepare_params(params):
    """Fuse c2i/c2h column-wise and split the fused weight into per-input row blocks.

    The hidden row block is zero-padded on its `interm` rows to [FUSED_OUT, FUSED_OUT] so
    the recurrent dot can consume the full [B, FUSED_OUT] state scratch with no lane slice.
    Done once, not per generation step.
    """
    w_c2i, b_c2i, w_c2h, b_c2h, w_i2o, b_i2o = params
    w_cat = jnp.concatenate([w_c2i, w_c2h], axis=1)             # [COMBINED, FUSED_OUT]
    b_cat = jnp.concatenate([b_c2i, b_c2h], axis=1)             # [1, FUSED_OUT]
    w_cat_c = w_cat[:N_CATEGORIES, :]                           # [8,  FUSED_OUT]
    w_cat_o = w_cat[N_CATEGORIES:N_CATEGORIES + INPUT_SIZE, :]  # [32, FUSED_OUT]
    w_cat_h = w_cat[N_CATEGORIES + INPUT_SIZE:, :]              # [32, FUSED_OUT]
    w_cat_h_pad = jnp.concatenate(
        [jnp.zeros((OUTPUT_SIZE, FUSED_OUT), jnp.float32), w_cat_h], axis=0)  # [64, FUSED_OUT]
    return (w_cat_c, w_cat_o, w_cat_h_pad, b_cat, w_i2o, b_i2o)


# --------------------------------- wrappers --------------------------------------
def generator_sequence_forward(category, prev_out_seq, prev_hidden, kernel_params):
    """Run T recurrent steps of the Generator cell in one kernel call.

    category:     [B, N_CATEGORIES]
    prev_out_seq: [T, B, INPUT_SIZE]   (teacher-forced per-step `prev_out` inputs)
    prev_hidden:  [B, HIDDEN_SIZE]     (initial hidden state)
    returns (log_probs [T, B, OUTPUT_SIZE], final_hidden [B, HIDDEN_SIZE])
    """
    T, B = prev_out_seq.shape[0], prev_out_seq.shape[1]
    w_cat_c, w_cat_o, w_cat_h_pad, b_cat, w_i2o, b_i2o = kernel_params

    # Initial state in the kernel's [interm | hidden] lane layout (one-time, wrapper-side).
    h0_pad = jnp.concatenate(
        [jnp.zeros((B, OUTPUT_SIZE), jnp.float32), prev_hidden], axis=1)     # [B, FUSED_OUT]

    weights = (w_cat_c, w_cat_o, w_cat_h_pad, b_cat, w_i2o, b_i2o)
    flops = 2 * B * (N_CATEGORIES * FUSED_OUT
                     + T * (INPUT_SIZE * FUSED_OUT
                            + FUSED_OUT * FUSED_OUT
                            + FUSED_OUT * OUTPUT_SIZE))
    transcendentals = T * B * (OUTPUT_SIZE + 1)                 # exp per logit + log per row
    bytes_accessed = 4 * (category.size + prev_out_seq.size + h0_pad.size
                          + sum(w.size for w in weights)
                          + T * B * OUTPUT_SIZE + B * FUSED_OUT)

    vmem = pl.BlockSpec(memory_space=pltpu.MemorySpace.VMEM)    # whole array, VMEM-resident
    logp, ih_final = pl.pallas_call(
        generator_seq_kernel,
        out_shape=(jax.ShapeDtypeStruct((T, B, OUTPUT_SIZE), jnp.float32),
                   jax.ShapeDtypeStruct((B, FUSED_OUT), jnp.float32)),
        in_specs=[vmem] * 9,
        out_specs=(vmem, vmem),
        scratch_shapes=[pltpu.VMEM((B, FUSED_OUT), jnp.float32)],
        cost_estimate=pl.CostEstimate(flops=flops,
                                      transcendentals=transcendentals,
                                      bytes_accessed=bytes_accessed),
    )(category, prev_out_seq, h0_pad, *weights)

    hidden = ih_final[:, OUTPUT_SIZE:]
    return logp, hidden


def generator_forward(category, prev_out, prev_hidden, kernel_params):
    """Single-step forward matching the PyTorch module's forward() signature."""
    logp, hidden = generator_sequence_forward(category, prev_out[None], prev_hidden,
                                              kernel_params)
    return logp[0], hidden


generator_sequence_forward_jit = jax.jit(generator_sequence_forward)
generator_forward_jit = jax.jit(generator_forward)


# ----------------------- deterministic parameter init ---------------------------
def init_params(key):
    def linear(key, fan_in, fan_out):
        # PyTorch nn.Linear default init: U(-1/sqrt(fan_in), 1/sqrt(fan_in)).
        # Weights stored transposed vs. torch ([in, out]) so kernels compute y = x @ W + b.
        k1, k2 = jax.random.split(key)
        bound = 1.0 / np.sqrt(fan_in)
        w = jax.random.uniform(k1, (fan_in, fan_out), jnp.float32, -bound, bound)
        b = jax.random.uniform(k2, (1, fan_out), jnp.float32, -bound, bound)
        return w, b

    k1, k2, k3 = jax.random.split(key, 3)
    w_c2i, b_c2i = linear(k1, COMBINED, OUTPUT_SIZE)
    w_c2h, b_c2h = linear(k2, COMBINED, HIDDEN_SIZE)
    w_i2o, b_i2o = linear(k3, OUTPUT_SIZE + HIDDEN_SIZE, OUTPUT_SIZE)
    return (w_c2i, b_c2i, w_c2h, b_c2h, w_i2o, b_i2o)


# ------------------------------ pure-JAX reference -------------------------------
def generator_ref_step(category, prev_out, prev_hidden, params):
    w_c2i, b_c2i, w_c2h, b_c2h, w_i2o, b_i2o = params
    combined = jnp.concatenate([category, prev_out, prev_hidden], axis=1)
    intermediate = combined @ w_c2i + b_c2i
    hidden = combined @ w_c2h + b_c2h
    ci = jnp.concatenate([intermediate, hidden], axis=1)
    output = ci @ w_i2o + b_i2o
    output = jax.nn.log_softmax(output, axis=1)
    return output, hidden


def generator_ref_sequence(category, prev_out_seq, prev_hidden, params):
    outs = []
    hidden = prev_hidden
    for t in range(prev_out_seq.shape[0]):
        o, hidden = generator_ref_step(category, prev_out_seq[t], hidden, params)
        outs.append(o)
    return jnp.stack(outs, axis=0), hidden


# ------------------------------------ main ---------------------------------------
if __name__ == "__main__":
    key = jax.random.PRNGKey(0)
    kp, kc, ko, kh = jax.random.split(key, 4)

    params = init_params(kp)
    kernel_params = prepare_params(params)          # one-time weight fusion / padding

    category     = jax.random.normal(kc, (BATCH, N_CATEGORIES), jnp.float32)
    prev_out_seq = jax.random.normal(ko, (SEQ_LEN, BATCH, INPUT_SIZE), jnp.float32)
    prev_hidden  = jax.random.normal(kh, (BATCH, HIDDEN_SIZE), jnp.float32)

    # Multi-step (recurrence folded into one kernel call).
    logp, hid = generator_sequence_forward_jit(category, prev_out_seq, prev_hidden,
                                               kernel_params)
    jax.block_until_ready((logp, hid))

    logp_ref, hid_ref = generator_ref_sequence(category, prev_out_seq, prev_hidden, params)
    np.testing.assert_allclose(np.asarray(logp), np.asarray(logp_ref), rtol=1e-4, atol=1e-4)
    np.testing.assert_allclose(np.asarray(hid), np.asarray(hid_ref), rtol=1e-4, atol=1e-4)

    # Single step (exact module forward() semantics).
    out1, hid1 = generator_forward_jit(category, prev_out_seq[0], prev_hidden, kernel_params)
    jax.block_until_ready((out1, hid1))
    out1_ref, hid1_ref = generator_ref_step(category, prev_out_seq[0], prev_hidden, params)
    np.testing.assert_allclose(np.asarray(out1), np.asarray(out1_ref), rtol=1e-4, atol=1e-4)
    np.testing.assert_allclose(np.asarray(hid1), np.asarray(hid1_ref), rtol=1e-4, atol=1e-4)

    print("KERNEL_OK")
</pallas_src>

<mosaic_0001>
module attributes {stable_mosaic.version = 11 : i64} {
  func.func @generator_seq_kernel(%arg0: memref<8x8xf32, #tpu.memory_space<vmem>>, %arg1: memref<8x8x32xf32, #tpu.memory_space<vmem>>, %arg2: memref<8x64xf32, #tpu.memory_space<vmem>>, %arg3: memref<8x64xf32, #tpu.memory_space<vmem>>, %arg4: memref<32x64xf32, #tpu.memory_space<vmem>>, %arg5: memref<64x64xf32, #tpu.memory_space<vmem>>, %arg6: memref<1x64xf32, #tpu.memory_space<vmem>>, %arg7: memref<64x32xf32, #tpu.memory_space<vmem>>, %arg8: memref<1x32xf32, #tpu.memory_space<vmem>>, %arg9: memref<8x8x32xf32, #tpu.memory_space<vmem>>, %arg10: memref<8x64xf32, #tpu.memory_space<vmem>>, %arg11: memref<8x64xf32, #tpu.memory_space<vmem>>) attributes {dimension_semantics = [], scalar_prefetch = 0 : i64, scratch_operands = 1 : i64, tpu.core_type = #tpu.core_type<tc>} {
    %c0 = arith.constant 0 : index
    %c0_0 = arith.constant 0 : index
    %0 = vector.load %arg0[%c0, %c0_0] : memref<8x8xf32, #tpu.memory_space<vmem>>, vector<8x8xf32>
    %c0_1 = arith.constant 0 : index
    %c0_2 = arith.constant 0 : index
    %1 = vector.load %arg3[%c0_1, %c0_2] : memref<8x64xf32, #tpu.memory_space<vmem>>, vector<8x64xf32>
    %cst = arith.constant dense<0.000000e+00> : vector<8x64xf32>
    %2 = tpu.matmul %0, %1, %cst {dimension_numbers = #tpu.dot_dimension_numbers<[1], [0], [0], [1], [0, 0, 1, 1], [], []>} : vector<8x8xf32>, vector<8x64xf32>, vector<8x64xf32> -> vector<8x64xf32>
    %c0_3 = arith.constant 0 : index
    %c0_4 = arith.constant 0 : index
    %3 = vector.load %arg6[%c0_3, %c0_4] : memref<1x64xf32, #tpu.memory_space<vmem>>, vector<1x64xf32>
    %4 = vector.broadcast %3 : vector<1x64xf32> to vector<8x64xf32>
    %5 = arith.addf %2, %4 : vector<8x64xf32>
    %c0_5 = arith.constant 0 : index
    %c0_6 = arith.constant 0 : index
    %6 = vector.load %arg2[%c0_5, %c0_6] : memref<8x64xf32, #tpu.memory_space<vmem>>, vector<8x64xf32>
    %c0_7 = arith.constant 0 : index
    %c0_8 = arith.constant 0 : index
    %7 = vector.load %arg11[%c0_7, %c0_8] : memref<8x64xf32, #tpu.memory_space<vmem>>, vector<8x64xf32>
    tpu.vector_store %arg11[%c0_7, %c0_8], %6 {strides = array<i32>} : memref<8x64xf32, #tpu.memory_space<vmem>>, vector<8x64xf32>,
    %c0_i32 = arith.constant 0 : i32
    %8 = arith.index_cast %c0_i32 : i32 to index
    %c0_9 = arith.constant 0 : index
    %c0_10 = arith.constant 0 : index
    %9 = vector.load %arg1[%8, %c0_9, %c0_10] : memref<8x8x32xf32, #tpu.memory_space<vmem>>, vector<1x8x32xf32>
    %10 = vector.shape_cast %9 : vector<1x8x32xf32> to vector<8x32xf32>
    %c0_11 = arith.constant 0 : index
    %c0_12 = arith.constant 0 : index
    %11 = vector.load %arg4[%c0_11, %c0_12] : memref<32x64xf32, #tpu.memory_space<vmem>>, vector<32x64xf32>
    %cst_13 = arith.constant dense<0.000000e+00> : vector<8x64xf32>
    %12 = tpu.matmul %10, %11, %cst_13 {dimension_numbers = #tpu.dot_dimension_numbers<[1], [0], [0], [1], [0, 0, 1, 1], [], []>} : vector<8x32xf32>, vector<32x64xf32>, vector<8x64xf32> -> vector<8x64xf32>
    %13 = arith.addf %5, %12 : vector<8x64xf32>
    %c0_14 = arith.constant 0 : index
    %c0_15 = arith.constant 0 : index
    %14 = vector.load %arg11[%c0_14, %c0_15] : memref<8x64xf32, #tpu.memory_space<vmem>>, vector<8x64xf32>
    %c0_16 = arith.constant 0 : index
    %c0_17 = arith.constant 0 : index
    %15 = vector.load %arg5[%c0_16, %c0_17] : memref<64x64xf32, #tpu.memory_space<vmem>>, vector<64x64xf32>
    %cst_18 = arith.constant dense<0.000000e+00> : vector<8x64xf32>
    %16 = tpu.matmul %14, %15, %cst_18 {dimension_numbers = #tpu.dot_dimension_numbers<[1], [0], [0], [1], [0, 0, 1, 1], [], []>} : vector<8x64xf32>, vector<64x64xf32>, vector<8x64xf32> -> vector<8x64xf32>
    %17 = arith.addf %13, %16 : vector<8x64xf32>
    %c0_19 = arith.constant 0 : index
    %c0_20 = arith.constant 0 : index
    %18 = vector.load %arg7[%c0_19, %c0_20] : memref<64x32xf32, #tpu.memory_space<vmem>>, vector<64x32xf32>
    %cst_21 = arith.constant dense<0.000000e+00> : vector<8x32xf32>
    %19 = tpu.matmul %17, %18, %cst_21 {dimension_numbers = #tpu.dot_dimension_numbers<[1], [0], [0], [1], [0, 0, 1, 1], [], []>} : vector<8x64xf32>, vector<64x32xf32>, vector<8x32xf32> -> vector<8x32xf32>
    %c0_22 = arith.constant 0 : index
    %c0_23 = arith.constant 0 : index
    %20 = vector.load %arg8[%c0_22, %c0_23] : memref<1x32xf32, #tpu.memory_space<vmem>>, vector<1x32xf32>
    %21 = vector.broadcast %20 : vector<1x32xf32> to vector<8x32xf32>
    %22 = arith.addf %19, %21 : vector<8x32xf32>
    %cst_24 = arith.constant dense<0xFF800000> : vector<8xf32>
    %23 = vector.multi_reduction <maximumf>, %22, %cst_24 [1] : vector<8x32xf32> to vector<8xf32>
    %24 = vector.shape_cast %23 : vector<8xf32> to vector<8x1xf32>
    %25 = vector.broadcast %24 : vector<8x1xf32> to vector<8x32xf32>
    %26 = arith.subf %22, %25 : vector<8x32xf32>
    %27 = math.exp %26 : vector<8x32xf32>
    %cst_25 = arith.constant dense<0.000000e+00> : vector<8xf32>
    %28 = vector.multi_reduction <add>, %27, %cst_25 [1] : vector<8x32xf32> to vector<8xf32>
    %29 = vector.shape_cast %28 : vector<8xf32> to vector<8x1xf32>
    %30 = math.log %29 : vector<8x1xf32>
    %31 = vector.broadcast %30 : vector<8x1xf32> to vector<8x32xf32>
    %32 = arith.subf %26, %31 : vector<8x32xf32>
    %33 = arith.index_cast %c0_i32 : i32 to index
    %c0_26 = arith.constant 0 : index
    %c0_27 = arith.constant 0 : index
    %34 = vector.load %arg9[%33, %c0_26, %c0_27] : memref<8x8x32xf32, #tpu.memory_space<vmem>>, vector<1x8x32xf32>
    %35 = vector.shape_cast %34 : vector<1x8x32xf32> to vector<8x32xf32>
    %36 = vector.shape_cast %32 : vector<8x32xf32> to vector<1x8x32xf32>
    tpu.vector_store %arg9[%33, %c0_26, %c0_27], %36 {strides = array<i32>} : memref<8x8x32xf32, #tpu.memory_space<vmem>>, vector<1x8x32xf32>,
    %c0_28 = arith.constant 0 : index
    %c0_29 = arith.constant 0 : index
    %37 = vector.load %arg11[%c0_28, %c0_29] : memref<8x64xf32, #tpu.memory_space<vmem>>, vector<8x64xf32>
    tpu.vector_store %arg11[%c0_28, %c0_29], %17 {strides = array<i32>} : memref<8x64xf32, #tpu.memory_space<vmem>>, vector<8x64xf32>,
    %c1_i32 = arith.constant 1 : i32
    %38 = arith.index_cast %c1_i32 : i32 to index
    %c0_30 = arith.constant 0 : index
    %c0_31 = arith.constant 0 : index
    %39 = vector.load %arg1[%38, %c0_30, %c0_31] : memref<8x8x32xf32, #tpu.memory_space<vmem>>, vector<1x8x32xf32>
    %40 = vector.shape_cast %39 : vector<1x8x32xf32> to vector<8x32xf32>
    %c0_32 = arith.constant 0 : index
    %c0_33 = arith.constant 0 : index
    %41 = vector.load %arg4[%c0_32, %c0_33] : memref<32x64xf32, #tpu.memory_space<vmem>>, vector<32x64xf32>
    %cst_34 = arith.constant dense<0.000000e+00> : vector<8x64xf32>
    %42 = tpu.matmul %40, %41, %cst_34 {dimension_numbers = #tpu.dot_dimension_numbers<[1], [0], [0], [1], [0, 0, 1, 1], [], []>} : vector<8x32xf32>, vector<32x64xf32>, vector<8x64xf32> -> vector<8x64xf32>
    %43 = arith.addf %5, %42 : vector<8x64xf32>
    %c0_35 = arith.constant 0 : index
    %c0_36 = arith.constant 0 : index
    %44 = vector.load %arg11[%c0_35, %c0_36] : memref<8x64xf32, #tpu.memory_space<vmem>>, vector<8x64xf32>
    %c0_37 = arith.constant 0 : index
    %c0_38 = arith.constant 0 : index
    %45 = vector.load %arg5[%c0_37, %c0_38] : memref<64x64xf32, #tpu.memory_space<vmem>>, vector<64x64xf32>
    %cst_39 = arith.constant dense<0.000000e+00> : vector<8x64xf32>
    %46 = tpu.matmul %44, %45, %cst_39 {dimension_numbers = #tpu.dot_dimension_numbers<[1], [0], [0], [1], [0, 0, 1, 1], [], []>} : vector<8x64xf32>, vector<64x64xf32>, vector<8x64xf32> -> vector<8x64xf32>
    %47 = arith.addf %43, %46 : vector<8x64xf32>
    %c0_40 = arith.constant 0 : index
    %c0_41 = arith.constant 0 : index
    %48 = vector.load %arg7[%c0_40, %c0_41] : memref<64x32xf32, #tpu.memory_space<vmem>>, vector<64x32xf32>
    %cst_42 = arith.constant dense<0.000000e+00> : vector<8x32xf32>
    %49 = tpu.matmul %47, %48, %cst_42 {dimension_numbers = #tpu.dot_dimension_numbers<[1], [0], [0], [1], [0, 0, 1, 1], [], []>} : vector<8x64xf32>, vector<64x32xf32>, vector<8x32xf32> -> vector<8x32xf32>
    %c0_43 = arith.constant 0 : index
    %c0_44 = arith.constant 0 : index
    %50 = vector.load %arg8[%c0_43, %c0_44] : memref<1x32xf32, #tpu.memory_space<vmem>>, vector<1x32xf32>
    %51 = vector.broadcast %50 : vector<1x32xf32> to vector<8x32xf32>
    %52 = arith.addf %49, %51 : vector<8x32xf32>
    %cst_45 = arith.constant dense<0xFF800000> : vector<8xf32>
    %53 = vector.multi_reduction <maximumf>, %52, %cst_45 [1] : vector<8x32xf32> to vector<8xf32>
    %54 = vector.shape_cast %53 : vector<8xf32> to vector<8x1xf32>
    %55 = vector.broadcast %54 : vector<8x1xf32> to vector<8x32xf32>
    %56 = arith.subf %52, %55 : vector<8x32xf32>
    %57 = math.exp %56 : vector<8x32xf32>
    %cst_46 = arith.constant dense<0.000000e+00> : vector<8xf32>
    %58 = vector.multi_reduction <add>, %57, %cst_46 [1] : vector<8x32xf32> to vector<8xf32>
    %59 = vector.shape_cast %58 : vector<8xf32> to vector<8x1xf32>
    %60 = math.log %59 : vector<8x1xf32>
    %61 = vector.broadcast %60 : vector<8x1xf32> to vector<8x32xf32>
    %62 = arith.subf %56, %61 : vector<8x32xf32>
    %63 = arith.index_cast %c1_i32 : i32 to index
    %c0_47 = arith.constant 0 : index
    %c0_48 = arith.constant 0 : index
    %64 = vector.load %arg9[%63, %c0_47, %c0_48] : memref<8x8x32xf32, #tpu.memory_space<vmem>>, vector<1x8x32xf32>
    %65 = vector.shape_cast %64 : vector<1x8x32xf32> to vector<8x32xf32>
    %66 = vector.shape_cast %62 : vector<8x32xf32> to vector<1x8x32xf32>
    tpu.vector_store %arg9[%63, %c0_47, %c0_48], %66 {strides = array<i32>} : memref<8x8x32xf32, #tpu.memory_space<vmem>>, vector<1x8x32xf32>,
    %c0_49 = arith.constant 0 : index
    %c0_50 = arith.constant 0 : index
    %67 = vector.load %arg11[%c0_49, %c0_50] : memref<8x64xf32, #tpu.memory_space<vmem>>, vector<8x64xf32>
    tpu.vector_store %arg11[%c0_49, %c0_50], %47 {strides = array<i32>} : memref<8x64xf32, #tpu.memory_space<vmem>>, vector<8x64xf32>,
    %c2_i32 = arith.constant 2 : i32
    %68 = arith.index_cast %c2_i32 : i32 to index
    %c0_51 = arith.constant 0 : index
    %c0_52 = arith.constant 0 : index
    %69 = vector.load %arg1[%68, %c0_51, %c0_52] : memref<8x8x32xf32, #tpu.memory_space<vmem>>, vector<1x8x32xf32>
    %70 = vector.shape_cast %69 : vector<1x8x32xf32> to vector<8x32xf32>
    %c0_53 = arith.constant 0 : index
    %c0_54 = arith.constant 0 : index
    %71 = vector.load %arg4[%c0_53, %c0_54] : memref<32x64xf32, #tpu.memory_space<vmem>>, vector<32x64xf32>
    %cst_55 = arith.constant dense<0.000000e+00> : vector<8x64xf32>
    %72 = tpu.matmul %70, %71, %cst_55 {dimension_numbers = #tpu.dot_dimension_numbers<[1], [0], [0], [1], [0, 0, 1, 1], [], []>} : vector<8x32xf32>, vector<32x64xf32>, vector<8x64xf32> -> vector<8x64xf32>
    %73 = arith.addf %5, %72 : vector<8x64xf32>
    %c0_56 = arith.constant 0 : index
    %c0_57 = arith.constant 0 : index
    %74 = vector.load %arg11[%c0_56, %c0_57] : memref<8x64xf32, #tpu.memory_space<vmem>>, vector<8x64xf32>
    %c0_58 = arith.constant 0 : index
    %c0_59 = arith.constant 0 : index
    %75 = vector.load %arg5[%c0_58, %c0_59] : memref<64x64xf32, #tpu.memory_space<vmem>>, vector<64x64xf32>
    %cst_60 = arith.constant dense<0.000000e+00> : vector<8x64xf32>
    %76 = tpu.matmul %74, %75, %cst_60 {dimension_numbers = #tpu.dot_dimension_numbers<[1], [0], [0], [1], [0, 0, 1, 1], [], []>} : vector<8x64xf32>, vector<64x64xf32>, vector<8x64xf32> -> vector<8x64xf32>
    %77 = arith.addf %73, %76 : vector<8x64xf32>
    %c0_61 = arith.constant 0 : index
    %c0_62 = arith.constant 0 : index
    %78 = vector.load %arg7[%c0_61, %c0_62] : memref<64x32xf32, #tpu.memory_space<vmem>>, vector<64x32xf32>
    %cst_63 = arith.constant dense<0.000000e+00> : vector<8x32xf32>
    %79 = tpu.matmul %77, %78, %cst_63 {dimension_numbers = #tpu.dot_dimension_numbers<[1], [0], [0], [1], [0, 0, 1, 1], [], []>} : vector<8x64xf32>, vector<64x32xf32>, vector<8x32xf32> -> vector<8x32xf32>
    %c0_64 = arith.constant 0 : index
    %c0_65 = arith.constant 0 : index
    %80 = vector.load %arg8[%c0_64, %c0_65] : memref<1x32xf32, #tpu.memory_space<vmem>>, vector<1x32xf32>
    %81 = vector.broadcast %80 : vector<1x32xf32> to vector<8x32xf32>
    %82 = arith.addf %79, %81 : vector<8x32xf32>
    %cst_66 = arith.constant dense<0xFF800000> : vector<8xf32>
    %83 = vector.multi_reduction <maximumf>, %82, %cst_66 [1] : vector<8x32xf32> to vector<8xf32>
    %84 = vector.shape_cast %83 : vector<8xf32> to vector<8x1xf32>
    %85 = vector.broadcast %84 : vector<8x1xf32> to vector<8x32xf32>
    %86 = arith.subf %82, %85 : vector<8x32xf32>
    %87 = math.exp %86 : vector<8x32xf32>
    %cst_67 = arith.constant dense<0.000000e+00> : vector<8xf32>
    %88 = vector.multi_reduction <add>, %87, %cst_67 [1] : vector<8x32xf32> to vector<8xf32>
    %89 = vector.shape_cast %88 : vector<8xf32> to vector<8x1xf32>
    %90 = math.log %89 : vector<8x1xf32>
    %91 = vector.broadcast %90 : vector<8x1xf32> to vector<8x32xf32>
    %92 = arith.subf %86, %91 : vector<8x32xf32>
    %93 = arith.index_cast %c2_i32 : i32 to index
    %c0_68 = arith.constant 0 : index
    %c0_69 = arith.constant 0 : index
    %94 = vector.load %arg9[%93, %c0_68, %c0_69] : memref<8x8x32xf32, #tpu.memory_space<vmem>>, vector<1x8x32xf32>
    %95 = vector.shape_cast %94 : vector<1x8x32xf32> to vector<8x32xf32>
    %96 = vector.shape_cast %92 : vector<8x32xf32> to vector<1x8x32xf32>
    tpu.vector_store %arg9[%93, %c0_68, %c0_69], %96 {strides = array<i32>} : memref<8x8x32xf32, #tpu.memory_space<vmem>>, vector<1x8x32xf32>,
    %c0_70 = arith.constant 0 : index
    %c0_71 = arith.constant 0 : index
    %97 = vector.load %arg11[%c0_70, %c0_71] : memref<8x64xf32, #tpu.memory_space<vmem>>, vector<8x64xf32>
    tpu.vector_store %arg11[%c0_70, %c0_71], %77 {strides = array<i32>} : memref<8x64xf32, #tpu.memory_space<vmem>>, vector<8x64xf32>,
    %c3_i32 = arith.constant 3 : i32
    %98 = arith.index_cast %c3_i32 : i32 to index
    %c0_72 = arith.constant 0 : index
    %c0_73 = arith.constant 0 : index
    %99 = vector.load %arg1[%98, %c0_72, %c0_73] : memref<8x8x32xf32, #tpu.memory_space<vmem>>, vector<1x8x32xf32>
    %100 = vector.shape_cast %99 : vector<1x8x32xf32> to vector<8x32xf32>
    %c0_74 = arith.constant 0 : index
    %c0_75 = arith.constant 0 : index
    %101 = vector.load %arg4[%c0_74, %c0_75] : memref<32x64xf32, #tpu.memory_space<vmem>>, vector<32x64xf32>
    %cst_76 = arith.constant dense<0.000000e+00> : vector<8x64xf32>
    %102 = tpu.matmul %100, %101, %cst_76 {dimension_numbers = #tpu.dot_dimension_numbers<[1], [0], [0], [1], [0, 0, 1, 1], [], []>} : vector<8x32xf32>, vector<32x64xf32>, vector<8x64xf32> -> vector<8x64xf32>
    %103 = arith.addf %5, %102 : vector<8x64xf32>
    %c0_77 = arith.constant 0 : index
    %c0_78 = arith.constant 0 : index
    %104 = vector.load %arg11[%c0_77, %c0_78] : memref<8x64xf32, #tpu.memory_space<vmem>>, vector<8x64xf32>
    %c0_79 = arith.constant 0 : index
    %c0_80 = arith.constant 0 : index
    %105 = vector.load %arg5[%c0_79, %c0_80] : memref<64x64xf32, #tpu.memory_space<vmem>>, vector<64x64xf32>
    %cst_81 = arith.constant dense<0.000000e+00> : vector<8x64xf32>
    %106 = tpu.matmul %104, %105, %cst_81 {dimension_numbers = #tpu.dot_dimension_numbers<[1], [0], [0], [1], [0, 0, 1, 1], [], []>} : vector<8x64xf32>, vector<64x64xf32>, vector<8x64xf32> -> vector<8x64xf32>
    %107 = arith.addf %103, %106 : vector<8x64xf32>
    %c0_82 = arith.constant 0 : index
    %c0_83 = arith.constant 0 : index
    %108 = vector.load %arg7[%c0_82, %c0_83] : memref<64x32xf32, #tpu.memory_space<vmem>>, vector<64x32xf32>
    %cst_84 = arith.constant dense<0.000000e+00> : vector<8x32xf32>
    %109 = tpu.matmul %107, %108, %cst_84 {dimension_numbers = #tpu.dot_dimension_numbers<[1], [0], [0], [1], [0, 0, 1, 1], [], []>} : vector<8x64xf32>, vector<64x32xf32>, vector<8x32xf32> -> vector<8x32xf32>
    %c0_85 = arith.constant 0 : index
    %c0_86 = arith.constant 0 : index
    %110 = vector.load %arg8[%c0_85, %c0_86] : memref<1x32xf32, #tpu.memory_space<vmem>>, vector<1x32xf32>
    %111 = vector.broadcast %110 : vector<1x32xf32> to vector<8x32xf32>
    %112 = arith.addf %109, %111 : vector<8x32xf32>
    %cst_87 = arith.constant dense<0xFF800000> : vector<8xf32>
    %113 = vector.multi_reduction <maximumf>, %112, %cst_87 [1] : vector<8x32xf32> to vector<8xf32>
    %114 = vector.shape_cast %113 : vector<8xf32> to vector<8x1xf32>
    %115 = vector.broadcast %114 : vector<8x1xf32> to vector<8x32xf32>
    %116 = arith.subf %112, %115 : vector<8x32xf32>
    %117 = math.exp %116 : vector<8x32xf32>
    %cst_88 = arith.constant dense<0.000000e+00> : vector<8xf32>
    %118 = vector.multi_reduction <add>, %117, %cst_88 [1] : vector<8x32xf32> to vector<8xf32>
    %119 = vector.shape_cast %118 : vector<8xf32> to vector<8x1xf32>
    %120 = math.log %119 : vector<8x1xf32>
    %121 = vector.broadcast %120 : vector<8x1xf32> to vector<8x32xf32>
    %122 = arith.subf %116, %121 : vector<8x32xf32>
    %123 = arith.index_cast %c3_i32 : i32 to index
    %c0_89 = arith.constant 0 : index
    %c0_90 = arith.constant 0 : index
    %124 = vector.load %arg9[%123, %c0_89, %c0_90] : memref<8x8x32xf32, #tpu.memory_space<vmem>>, vector<1x8x32xf32>
    %125 = vector.shape_cast %124 : vector<1x8x32xf32> to vector<8x32xf32>
    %126 = vector.shape_cast %122 : vector<8x32xf32> to vector<1x8x32xf32>
    tpu.vector_store %arg9[%123, %c0_89, %c0_90], %126 {strides = array<i32>} : memref<8x8x32xf32, #tpu.memory_space<vmem>>, vector<1x8x32xf32>,
    %c0_91 = arith.constant 0 : index
    %c0_92 = arith.constant 0 : index
    %127 = vector.load %arg11[%c0_91, %c0_92] : memref<8x64xf32, #tpu.memory_space<vmem>>, vector<8x64xf32>
    tpu.vector_store %arg11[%c0_91, %c0_92], %107 {strides = array<i32>} : memref<8x64xf32, #tpu.memory_space<vmem>>, vector<8x64xf32>,
    %c4_i32 = arith.constant 4 : i32
    %128 = arith.index_cast %c4_i32 : i32 to index
    %c0_93 = arith.constant 0 : index
    %c0_94 = arith.constant 0 : index
    %129 = vector.load %arg1[%128, %c0_93, %c0_94] : memref<8x8x32xf32, #tpu.memory_space<vmem>>, vector<1x8x32xf32>
    %130 = vector.shape_cast %129 : vector<1x8x32xf32> to vector<8x32xf32>
    %c0_95 = arith.constant 0 : index
    %c0_96 = arith.constant 0 : index
    %131 = vector.load %arg4[%c0_95, %c0_96] : memref<32x64xf32, #tpu.memory_space<vmem>>, vector<32x64xf32>
    %cst_97 = arith.constant dense<0.000000e+00> : vector<8x64xf32>
    %132 = tpu.matmul %130, %131, %cst_97 {dimension_numbers = #tpu.dot_dimension_numbers<[1], [0], [0], [1], [0, 0, 1, 1], [], []>} : vector<8x32xf32>, vector<32x64xf32>, vector<8x64xf32> -> vector<8x64xf32>
    %133 = arith.addf %5, %132 : vector<8x64xf32>
    %c0_98 = arith.constant 0 : index
    %c0_99 = arith.constant 0 : index
    %134 = vector.load %arg11[%c0_98, %c0_99] : memref<8x64xf32, #tpu.memory_space<vmem>>, vector<8x64xf32>
    %c0_100 = arith.constant 0 : index
    %c0_101 = arith.constant 0 : index
    %135 = vector.load %arg5[%c0_100, %c0_101] : memref<64x64xf32, #tpu.memory_space<vmem>>, vector<64x64xf32>
    %cst_102 = arith.constant dense<0.000000e+00> : vector<8x64xf32>
    %136 = tpu.matmul %134, %135, %cst_102 {dimension_numbers = #tpu.dot_dimension_numbers<[1], [0], [0], [1], [0, 0, 1, 1], [], []>} : vector<8x64xf32>, vector<64x64xf32>, vector<8x64xf32> -> vector<8x64xf32>
    %137 = arith.addf %133, %136 : vector<8x64xf32>
    %c0_103 = arith.constant 0 : index
    %c0_104 = arith.constant 0 : index
    %138 = vector.load %arg7[%c0_103, %c0_104] : memref<64x32xf32, #tpu.memory_space<vmem>>, vector<64x32xf32>
    %cst_105 = arith.constant dense<0.000000e+00> : vector<8x32xf32>
    %139 = tpu.matmul %137, %138, %cst_105 {dimension_numbers = #tpu.dot_dimension_numbers<[1], [0], [0], [1], [0, 0, 1, 1], [], []>} : vector<8x64xf32>, vector<64x32xf32>, vector<8x32xf32> -> vector<8x32xf32>
    %c0_106 = arith.constant 0 : index
    %c0_107 = arith.constant 0 : index
    %140 = vector.load %arg8[%c0_106, %c0_107] : memref<1x32xf32, #tpu.memory_space<vmem>>, vector<1x32xf32>
    %141 = vector.broadcast %140 : vector<1x32xf32> to vector<8x32xf32>
    %142 = arith.addf %139, %141 : vector<8x32xf32>
    %cst_108 = arith.constant dense<0xFF800000> : vector<8xf32>
    %143 = vector.multi_reduction <maximumf>, %142, %cst_108 [1] : vector<8x32xf32> to vector<8xf32>
    %144 = vector.shape_cast %143 : vector<8xf32> to vector<8x1xf32>
    %145 = vector.broadcast %144 : vector<8x1xf32> to vector<8x32xf32>
    %146 = arith.subf %142, %145 : vector<8x32xf32>
    %147 = math.exp %146 : vector<8x32xf32>
    %cst_109 = arith.constant dense<0.000000e+00> : vector<8xf32>
    %148 = vector.multi_reduction <add>, %147, %cst_109 [1] : vector<8x32xf32> to vector<8xf32>
    %149 = vector.shape_cast %148 : vector<8xf32> to vector<8x1xf32>
    %150 = math.log %149 : vector<8x1xf32>
    %151 = vector.broadcast %150 : vector<8x1xf32> to vector<8x32xf32>
    %152 = arith.subf %146, %151 : vector<8x32xf32>
    %153 = arith.index_cast %c4_i32 : i32 to index
    %c0_110 = arith.constant 0 : index
    %c0_111 = arith.constant 0 : index
    %154 = vector.load %arg9[%153, %c0_110, %c0_111] : memref<8x8x32xf32, #tpu.memory_space<vmem>>, vector<1x8x32xf32>
    %155 = vector.shape_cast %154 : vector<1x8x32xf32> to vector<8x32xf32>
    %156 = vector.shape_cast %152 : vector<8x32xf32> to vector<1x8x32xf32>
    tpu.vector_store %arg9[%153, %c0_110, %c0_111], %156 {strides = array<i32>} : memref<8x8x32xf32, #tpu.memory_space<vmem>>, vector<1x8x32xf32>,
    %c0_112 = arith.constant 0 : index
    %c0_113 = arith.constant 0 : index
    %157 = vector.load %arg11[%c0_112, %c0_113] : memref<8x64xf32, #tpu.memory_space<vmem>>, vector<8x64xf32>
    tpu.vector_store %arg11[%c0_112, %c0_113], %137 {strides = array<i32>} : memref<8x64xf32, #tpu.memory_space<vmem>>, vector<8x64xf32>,
    %c5_i32 = arith.constant 5 : i32
    %158 = arith.index_cast %c5_i32 : i32 to index
    %c0_114 = arith.constant 0 : index
    %c0_115 = arith.constant 0 : index
    %159 = vector.load %arg1[%158, %c0_114, %c0_115] : memref<8x8x32xf32, #tpu.memory_space<vmem>>, vector<1x8x32xf32>
    %160 = vector.shape_cast %159 : vector<1x8x32xf32> to vector<8x32xf32>
    %c0_116 = arith.constant 0 : index
    %c0_117 = arith.constant 0 : index
    %161 = vector.load %arg4[%c0_116, %c0_117] : memref<32x64xf32, #tpu.memory_space<vmem>>, vector<32x64xf32>
    %cst_118 = arith.constant dense<0.000000e+00> : vector<8x64xf32>
    %162 = tpu.matmul %160, %161, %cst_118 {dimension_numbers = #tpu.dot_dimension_numbers<[1], [0], [0], [1], [0, 0, 1, 1], [], []>} : vector<8x32xf32>, vector<32x64xf32>, vector<8x64xf32> -> vector<8x64xf32>
    %163 = arith.addf %5, %162 : vector<8x64xf32>
    %c0_119 = arith.constant 0 : index
    %c0_120 = arith.constant 0 : index
    %164 = vector.load %arg11[%c0_119, %c0_120] : memref<8x64xf32, #tpu.memory_space<vmem>>, vector<8x64xf32>
    %c0_121 = arith.constant 0 : index
    %c0_122 = arith.constant 0 : index
    %165 = vector.load %arg5[%c0_121, %c0_122] : memref<64x64xf32, #tpu.memory_space<vmem>>, vector<64x64xf32>
    %cst_123 = arith.constant dense<0.000000e+00> : vector<8x64xf32>
    %166 = tpu.matmul %164, %165, %cst_123 {dimension_numbers = #tpu.dot_dimension_numbers<[1], [0], [0], [1], [0, 0, 1, 1], [], []>} : vector<8x64xf32>, vector<64x64xf32>, vector<8x64xf32> -> vector<8x64xf32>
    %167 = arith.addf %163, %166 : vector<8x64xf32>
    %c0_124 = arith.constant 0 : index
    %c0_125 = arith.constant 0 : index
    %168 = vector.load %arg7[%c0_124, %c0_125] : memref<64x32xf32, #tpu.memory_space<vmem>>, vector<64x32xf32>
    %cst_126 = arith.constant dense<0.000000e+00> : vector<8x32xf32>
    %169 = tpu.matmul %167, %168, %cst_126 {dimension_numbers = #tpu.dot_dimension_numbers<[1], [0], [0], [1], [0, 0, 1, 1], [], []>} : vector<8x64xf32>, vector<64x32xf32>, vector<8x32xf32> -> vector<8x32xf32>
    %c0_127 = arith.constant 0 : index
    %c0_128 = arith.constant 0 : index
    %170 = vector.load %arg8[%c0_127, %c0_128] : memref<1x32xf32, #tpu.memory_space<vmem>>, vector<1x32xf32>
    %171 = vector.broadcast %170 : vector<1x32xf32> to vector<8x32xf32>
    %172 = arith.addf %169, %171 : vector<8x32xf32>
    %cst_129 = arith.constant dense<0xFF800000> : vector<8xf32>
    %173 = vector.multi_reduction <maximumf>, %172, %cst_129 [1] : vector<8x32xf32> to vector<8xf32>
    %174 = vector.shape_cast %173 : vector<8xf32> to vector<8x1xf32>
    %175 = vector.broadcast %174 : vector<8x1xf32> to vector<8x32xf32>
    %176 = arith.subf %172, %175 : vector<8x32xf32>
    %177 = math.exp %176 : vector<8x32xf32>
    %cst_130 = arith.constant dense<0.000000e+00> : vector<8xf32>
    %178 = vector.multi_reduction <add>, %177, %cst_130 [1] : vector<8x32xf32> to vector<8xf32>
    %179 = vector.shape_cast %178 : vector<8xf32> to vector<8x1xf32>
    %180 = math.log %179 : vector<8x1xf32>
    %181 = vector.broadcast %180 : vector<8x1xf32> to vector<8x32xf32>
    %182 = arith.subf %176, %181 : vector<8x32xf32>
    %183 = arith.index_cast %c5_i32 : i32 to index
    %c0_131 = arith.constant 0 : index
    %c0_132 = arith.constant 0 : index
    %184 = vector.load %arg9[%183, %c0_131, %c0_132] : memref<8x8x32xf32, #tpu.memory_space<vmem>>, vector<1x8x32xf32>
    %185 = vector.shape_cast %184 : vector<1x8x32xf32> to vector<8x32xf32>
    %186 = vector.shape_cast %182 : vector<8x32xf32> to vector<1x8x32xf32>
    tpu.vector_store %arg9[%183, %c0_131, %c0_132], %186 {strides = array<i32>} : memref<8x8x32xf32, #tpu.memory_space<vmem>>, vector<1x8x32xf32>,
    %c0_133 = arith.constant 0 : index
    %c0_134 = arith.constant 0 : index
    %187 = vector.load %arg11[%c0_133, %c0_134] : memref<8x64xf32, #tpu.memory_space<vmem>>, vector<8x64xf32>
    tpu.vector_store %arg11[%c0_133, %c0_134], %167 {strides = array<i32>} : memref<8x64xf32, #tpu.memory_space<vmem>>, vector<8x64xf32>,
    %c6_i32 = arith.constant 6 : i32
    %188 = arith.index_cast %c6_i32 : i32 to index
    %c0_135 = arith.constant 0 : index
    %c0_136 = arith.constant 0 : index
    %189 = vector.load %arg1[%188, %c0_135, %c0_136] : memref<8x8x32xf32, #tpu.memory_space<vmem>>, vector<1x8x32xf32>
    %190 = vector.shape_cast %189 : vector<1x8x32xf32> to vector<8x32xf32>
    %c0_137 = arith.constant 0 : index
    %c0_138 = arith.constant 0 : index
    %191 = vector.load %arg4[%c0_137, %c0_138] : memref<32x64xf32, #tpu.memory_space<vmem>>, vector<32x64xf32>
    %cst_139 = arith.constant dense<0.000000e+00> : vector<8x64xf32>
    %192 = tpu.matmul %190, %191, %cst_139 {dimension_numbers = #tpu.dot_dimension_numbers<[1], [0], [0], [1], [0, 0, 1, 1], [], []>} : vector<8x32xf32>, vector<32x64xf32>, vector<8x64xf32> -> vector<8x64xf32>
    %193 = arith.addf %5, %192 : vector<8x64xf32>
    %c0_140 = arith.constant 0 : index
    %c0_141 = arith.constant 0 : index
    %194 = vector.load %arg11[%c0_140, %c0_141] : memref<8x64xf32, #tpu.memory_space<vmem>>, vector<8x64xf32>
    %c0_142 = arith.constant 0 : index
    %c0_143 = arith.constant 0 : index
    %195 = vector.load %arg5[%c0_142, %c0_143] : memref<64x64xf32, #tpu.memory_space<vmem>>, vector<64x64xf32>
    %cst_144 = arith.constant dense<0.000000e+00> : vector<8x64xf32>
    %196 = tpu.matmul %194, %195, %cst_144 {dimension_numbers = #tpu.dot_dimension_numbers<[1], [0], [0], [1], [0, 0, 1, 1], [], []>} : vector<8x64xf32>, vector<64x64xf32>, vector<8x64xf32> -> vector<8x64xf32>
    %197 = arith.addf %193, %196 : vector<8x64xf32>
    %c0_145 = arith.constant 0 : index
    %c0_146 = arith.constant 0 : index
    %198 = vector.load %arg7[%c0_145, %c0_146] : memref<64x32xf32, #tpu.memory_space<vmem>>, vector<64x32xf32>
    %cst_147 = arith.constant dense<0.000000e+00> : vector<8x32xf32>
    %199 = tpu.matmul %197, %198, %cst_147 {dimension_numbers = #tpu.dot_dimension_numbers<[1], [0], [0], [1], [0, 0, 1, 1], [], []>} : vector<8x64xf32>, vector<64x32xf32>, vector<8x32xf32> -> vector<8x32xf32>
    %c0_148 = arith.constant 0 : index
    %c0_149 = arith.constant 0 : index
    %200 = vector.load %arg8[%c0_148, %c0_149] : memref<1x32xf32, #tpu.memory_space<vmem>>, vector<1x32xf32>
    %201 = vector.broadcast %200 : vector<1x32xf32> to vector<8x32xf32>
    %202 = arith.addf %199, %201 : vector<8x32xf32>
    %cst_150 = arith.constant dense<0xFF800000> : vector<8xf32>
    %203 = vector.multi_reduction <maximumf>, %202, %cst_150 [1] : vector<8x32xf32> to vector<8xf32>
    %204 = vector.shape_cast %203 : vector<8xf32> to vector<8x1xf32>
    %205 = vector.broadcast %204 : vector<8x1xf32> to vector<8x32xf32>
    %206 = arith.subf %202, %205 : vector<8x32xf32>
    %207 = math.exp %206 : vector<8x32xf32>
    %cst_151 = arith.constant dense<0.000000e+00> : vector<8xf32>
    %208 = vector.multi_reduction <add>, %207, %cst_151 [1] : vector<8x32xf32> to vector<8xf32>
    %209 = vector.shape_cast %208 : vector<8xf32> to vector<8x1xf32>
    %210 = math.log %209 : vector<8x1xf32>
    %211 = vector.broadcast %210 : vector<8x1xf32> to vector<8x32xf32>
    %212 = arith.subf %206, %211 : vector<8x32xf32>
    %213 = arith.index_cast %c6_i32 : i32 to index
    %c0_152 = arith.constant 0 : index
    %c0_153 = arith.constant 0 : index
    %214 = vector.load %arg9[%213, %c0_152, %c0_153] : memref<8x8x32xf32, #tpu.memory_space<vmem>>, vector<1x8x32xf32>
    %215 = vector.shape_cast %214 : vector<1x8x32xf32> to vector<8x32xf32>
    %216 = vector.shape_cast %212 : vector<8x32xf32> to vector<1x8x32xf32>
    tpu.vector_store %arg9[%213, %c0_152, %c0_153], %216 {strides = array<i32>} : memref<8x8x32xf32, #tpu.memory_space<vmem>>, vector<1x8x32xf32>,
    %c0_154 = arith.constant 0 : index
    %c0_155 = arith.constant 0 : index
    %217 = vector.load %arg11[%c0_154, %c0_155] : memref<8x64xf32, #tpu.memory_space<vmem>>, vector<8x64xf32>
    tpu.vector_store %arg11[%c0_154, %c0_155], %197 {strides = array<i32>} : memref<8x64xf32, #tpu.memory_space<vmem>>, vector<8x64xf32>,
    %c7_i32 = arith.constant 7 : i32
    %218 = arith.index_cast %c7_i32 : i32 to index
    %c0_156 = arith.constant 0 : index
    %c0_157 = arith.constant 0 : index
    %219 = vector.load %arg1[%218, %c0_156, %c0_157] : memref<8x8x32xf32, #tpu.memory_space<vmem>>, vector<1x8x32xf32>
    %220 = vector.shape_cast %219 : vector<1x8x32xf32> to vector<8x32xf32>
    %c0_158 = arith.constant 0 : index
    %c0_159 = arith.constant 0 : index
    %221 = vector.load %arg4[%c0_158, %c0_159] : memref<32x64xf32, #tpu.memory_space<vmem>>, vector<32x64xf32>
    %cst_160 = arith.constant dense<0.000000e+00> : vector<8x64xf32>
    %222 = tpu.matmul %220, %221, %cst_160 {dimension_numbers = #tpu.dot_dimension_numbers<[1], [0], [0], [1], [0, 0, 1, 1], [], []>} : vector<8x32xf32>, vector<32x64xf32>, vector<8x64xf32> -> vector<8x64xf32>
    %223 = arith.addf %5, %222 : vector<8x64xf32>
    %c0_161 = arith.constant 0 : index
    %c0_162 = arith.constant 0 : index
    %224 = vector.load %arg11[%c0_161, %c0_162] : memref<8x64xf32, #tpu.memory_space<vmem>>, vector<8x64xf32>
    %c0_163 = arith.constant 0 : index
    %c0_164 = arith.constant 0 : index
    %225 = vector.load %arg5[%c0_163, %c0_164] : memref<64x64xf32, #tpu.memory_space<vmem>>, vector<64x64xf32>
    %cst_165 = arith.constant dense<0.000000e+00> : vector<8x64xf32>
    %226 = tpu.matmul %224, %225, %cst_165 {dimension_numbers = #tpu.dot_dimension_numbers<[1], [0], [0], [1], [0, 0, 1, 1], [], []>} : vector<8x64xf32>, vector<64x64xf32>, vector<8x64xf32> -> vector<8x64xf32>
    %227 = arith.addf %223, %226 : vector<8x64xf32>
    %c0_166 = arith.constant 0 : index
    %c0_167 = arith.constant 0 : index
    %228 = vector.load %arg7[%c0_166, %c0_167] : memref<64x32xf32, #tpu.memory_space<vmem>>, vector<64x32xf32>
    %cst_168 = arith.constant dense<0.000000e+00> : vector<8x32xf32>
    %229 = tpu.matmul %227, %228, %cst_168 {dimension_numbers = #tpu.dot_dimension_numbers<[1], [0], [0], [1], [0, 0, 1, 1], [], []>} : vector<8x64xf32>, vector<64x32xf32>, vector<8x32xf32> -> vector<8x32xf32>
    %c0_169 = arith.constant 0 : index
    %c0_170 = arith.constant 0 : index
    %230 = vector.load %arg8[%c0_169, %c0_170] : memref<1x32xf32, #tpu.memory_space<vmem>>, vector<1x32xf32>
    %231 = vector.broadcast %230 : vector<1x32xf32> to vector<8x32xf32>
    %232 = arith.addf %229, %231 : vector<8x32xf32>
    %cst_171 = arith.constant dense<0xFF800000> : vector<8xf32>
    %233 = vector.multi_reduction <maximumf>, %232, %cst_171 [1] : vector<8x32xf32> to vector<8xf32>
    %234 = vector.shape_cast %233 : vector<8xf32> to vector<8x1xf32>
    %235 = vector.broadcast %234 : vector<8x1xf32> to vector<8x32xf32>
    %236 = arith.subf %232, %235 : vector<8x32xf32>
    %237 = math.exp %236 : vector<8x32xf32>
    %cst_172 = arith.constant dense<0.000000e+00> : vector<8xf32>
    %238 = vector.multi_reduction <add>, %237, %cst_172 [1] : vector<8x32xf32> to vector<8xf32>
    %239 = vector.shape_cast %238 : vector<8xf32> to vector<8x1xf32>
    %240 = math.log %239 : vector<8x1xf32>
    %241 = vector.broadcast %240 : vector<8x1xf32> to vector<8x32xf32>
    %242 = arith.subf %236, %241 : vector<8x32xf32>
    %243 = arith.index_cast %c7_i32 : i32 to index
    %c0_173 = arith.constant 0 : index
    %c0_174 = arith.constant 0 : index
    %244 = vector.load %arg9[%243, %c0_173, %c0_174] : memref<8x8x32xf32, #tpu.memory_space<vmem>>, vector<1x8x32xf32>
    %245 = vector.shape_cast %244 : vector<1x8x32xf32> to vector<8x32xf32>
    %246 = vector.shape_cast %242 : vector<8x32xf32> to vector<1x8x32xf32>
    tpu.vector_store %arg9[%243, %c0_173, %c0_174], %246 {strides = array<i32>} : memref<8x8x32xf32, #tpu.memory_space<vmem>>, vector<1x8x32xf32>,
    %c0_175 = arith.constant 0 : index
    %c0_176 = arith.constant 0 : index
    %247 = vector.load %arg11[%c0_175, %c0_176] : memref<8x64xf32, #tpu.memory_space<vmem>>, vector<8x64xf32>
    tpu.vector_store %arg11[%c0_175, %c0_176], %227 {strides = array<i32>} : memref<8x64xf32, #tpu.memory_space<vmem>>, vector<8x64xf32>,
    %c8_i32 = arith.constant 8 : i32
    %c0_177 = arith.constant 0 : index
    %c0_178 = arith.constant 0 : index
    %248 = vector.load %arg11[%c0_177, %c0_178] : memref<8x64xf32, #tpu.memory_space<vmem>>, vector<8x64xf32>
    %c0_179 = arith.constant 0 : index
    %c0_180 = arith.constant 0 : index
    %249 = vector.load %arg10[%c0_179, %c0_180] : memref<8x64xf32, #tpu.memory_space<vmem>>, vector<8x64xf32>
    tpu.vector_store %arg10[%c0_179, %c0_180], %248 {strides = array<i32>} : memref<8x64xf32, #tpu.memory_space<vmem>>, vector<8x64xf32>,
    return
  }
}

</mosaic_0001>

<bundles_post_ra>
// kernel: generator_sequence_forward.1
= control target key start
LH: loop header
LB: loop body
LE: loop exit
PB: predicated region body
PF: predicated region fallthrough
CT: control target
= control target key end

     0   :  { %16 = vsyncpa [#allocation4], 0  ;;  %s3675_s0 = inlined_call_operand.vmem [shape: f32[8,8], index: 0, kind: input, shape index: {}]   ;;  %s3676_s1 = inlined_call_operand.vmem [shape: f32[8,8,32], index: 1, kind: input, shape index: {}]   ;;  %s3677_s2 = inlined_call_operand.vmem [shape: f32[8,64], index: 2, kind: input, shape index: {}]   ;;  %s3678_s3 = inlined_call_operand.vmem [shape: f32[8,64], index: 3, kind: input, shape index: {}]   ;;  %s3679_s4 = inlined_call_operand.vmem [shape: f32[32,64], index: 4, kind: input, shape index: {}]   ;;  %s3680_s5 = inlined_call_operand.hbm [shape: f32[64,64], index: 5, kind: input, shape index: {}]   ;;  %s3681_s6 = inlined_call_operand.vmem [shape: f32[1,64], index: 6, kind: input, shape index: {}]   ;;  %s3682_s7 = inlined_call_operand.vmem [shape: f32[64,32], index: 7, kind: input, shape index: {}]   ;;  %s3683_s8 = inlined_call_operand.vmem [shape: f32[1,32], index: 8, kind: input, shape index: {}]   ;;  %s3684_s9 = inlined_call_operand.hbm [shape: f32[8,8,32], index: 9, kind: output, shape index: {0}]   ;;  %s3685_s10 = inlined_call_operand.vmem [shape: f32[8,64], index: 10, kind: output, shape index: {1}]  }
   0x1   :  { %17 = vsyncpa [#allocation5], 0  ;;  %s2991_s13 = smov [#allocation3]  }
   0x2   :  { %s33_s14 = sshll.u32 %s2991_s13, 4  ;;  %s34_s14 = int_to_ptr.vmem [resolvable:$true] %s33_s14 }
   0x3   :  { %s2955_s15 = scalar_lea.vmem %s34_s14, 1024  ;;  %p2960_p1 = scmp.lt.s32.totalorder %s34_s14, %s34_s14 }
   0x4   :  { %p2956_p0 = scmp.ne.s32.totalorder %s34_s14, %s2955_s15  ;;  %p2961_p2 = scmp.lt.s32.totalorder %s2955_s15, %s2955_s15 }
   0x6   :  { %p2962_p3 = por %p2961_p2, %p2960_p1 }
   0x8   :  { %p2963_p4 = pnand %p2962_p3, %p2956_p0 }
   0xa   :  { %2966 = shalt.err (!%p2963_p4)
}
   0xb   :  { %s2992_s16 = smov 128   ;;  %s2993_s17 = smov 8  }
   0xc   :  { %39 = dma.hbm_to_vmem [thread:$0]  %s3680_s5, 1024, %s34_s14, [#allocation4], %s2992_s16, %s2992_s16, %s2993_s17  }
   0xd   :  { %2987 = dma.done.wait [#allocation4], 1024  }
   0xe   :  { %2988 = vsyncadd [#allocation4], 4294966272  ;;  %v2994_v0 = vmov 0.0   ;;  %vm2995_vm0 = vmmov 0   ;;  %vm58_vm1 = vcmask 64512   ;;  %v50_v1 = vld [vmem:[%s3678_s3] sm:$0xff] }
   0xf   :  { %2512 = vmatprep.subr.mxu0 %v2994_v0  ;;  %2517 = vmatprep.subr.mxu1 %v2994_v0  ;;  %v3070_v2 = vld [vmem:[%s3679_s4 + $0x18] sm:$0xff]  ;;  %v49_v3 = vld [vmem:[%s3675_s0] sm:$0xff]  ;;  %v3079_v4 = vld [vmem:[%s3679_s4 + $0x10] sm:$0xff]  ;;  %vm133_vm2 = vcmask 523264   ;;  %vm140_vm3 = vcmask 261120  }
  0x10   :  { %2514 = vmatprep.mubr.msk.f32.mxu0 %vm2995_vm0, %v2994_v0  ;;  %2525 = vmatprep.mubr.msk.f32.mxu1 %vm2995_vm0, %v2994_v0  ;;  %v3081_v5 = vld [vmem:[#allocation3 + $0x38] sm:$0xff]  ;;  %v3087_v6 = vld [vmem:[%s3679_s4 + $0x8] sm:$0xff]  ;;  %v3091_v7 = vld [vmem:[#allocation3 + $0x30] sm:$0xff] }
  0x11   :  { %2513 = vmatpush3.msra.mxu0 %v50_v1  ;;  %2518 = vmatpush3.msra.mxu1 %v3070_v2  ;;  %v3098_v8 = vld [vmem:[%s3679_s4] sm:$0xff]  ;;  %v3102_v9 = vld [vmem:[#allocation3 + $0x28] sm:$0xff]  ;;  %v3115_v12 = vld [vmem:[#allocation3 + $0x20] sm:$0xff] }
  0x12   :  { %2515 = vmatmul.mubr.msk.f32.vlgmr.msra.gmra.mxu0 %vm58_vm1, %v49_v3  ;;  %2519 = vmatprep.subr.mxu1 %v2994_v0  ;;  %v135_v10 = vld [vmem:[%s3676_s1] sm:$0xff]  ;;  %v3127_v14 = vld [vmem:[#allocation3 + $0x10] sm:$0xff]  ;;  %v3133_v15 = vld [vmem:[#allocation3 + $0x8] sm:$0xff] }
  0x13   :  { %2528 = vmatprep.subr.mxu0 %v2994_v0  ;;  %2520 = vmatpush3.msra.mxu1 %v3079_v4  ;;  %v132_v11 = vld [vmem:[%s3677_s2] sm:$0xff]  ;;  %v3137_v16 = vld [vmem:[#allocation3] sm:$0xff]  ;;  %v3163_v19 = vld [vmem:[%s3682_s7 + $0x38] sm:$0xff] }
  0x14   :  { %2529 = vmatpush3.msra.mxu0 %v3081_v5  ;;  %2521 = vmatprep.subr.mxu1 %v2994_v0  ;;  %134 = vst.msk [vmem:[#allocation2] sm:$0xff] %vm133_vm2, %v132_v11  ;;  %v3120_v13 = vld [vmem:[#allocation3 + $0x18] sm:$0xff]  ;;  %v2291_v18 = vld [vmem:[%s3676_s1 + $0x8] sm:$0xff]  ;;  %v3168_v20 = vld [vmem:[%s3682_s7 + $0x30] sm:$0xff] }
  0x15   :  { %2530 = vmatprep.subr.mxu0 %v2994_v0  ;;  %2522 = vmatpush3.msra.mxu1 %v3087_v6  ;;  %v3181_v21 = vld [vmem:[%s3682_s7 + $0x28] sm:$0xff]  ;;  %v3186_v22 = vld [vmem:[%s3682_s7 + $0x20] sm:$0xff]  ;;  %v3194_v23 = vld [vmem:[%s3682_s7 + $0x18] sm:$0xff] }
  0x16   :  { %2531 = vmatpush3.msra.mxu0 %v3091_v7  ;;  %2523 = vmatprep.subr.mxu1 %v2994_v0  ;;  %v3203_v24 = vld [vmem:[%s3682_s7 + $0x10] sm:$0xff]  ;;  %v3212_v25 = vld [vmem:[%s3682_s7 + $0x8] sm:$0xff]  ;;  %v3225_v26 = vld [vmem:[%s3682_s7] sm:$0xff] }
  0x17   :  { %2532 = vmatprep.subr.mxu0 %v2994_v0  ;;  %2524 = vmatpush3.msra.mxu1 %v3098_v8  ;;  %v2285_v31 = vld [vmem:[%s3681_s6] ss:$0 sm:$0xff]  ;;  %v2296_v40 = vld [vmem:[%s3676_s1 + $0x10] sm:$0xff]  ;;  %v2301_v53 = vld [vmem:[%s3676_s1 + $0x18] sm:$0xff] }
  0x18   :  { %2533 = vmatpush3.msra.mxu0 %v3102_v9  ;;  %2526 = vmatmul.mubr.msk.f32.vlgmr.msra.gmra.mxu1 %vm140_vm3, %v135_v10  ;;  %v3294_v41 = vld [vmem:[%s3683_s8] ss:$0 sm:$0xff] }
  0x19   :  { %2534 = vmatprep.subr.mxu0 %v2994_v0  ;;  %2544 = vmatprep.mubr.msk.f32.mxu0 %vm2995_vm0, %v2994_v0  ;;  %v2306_v3 = vld [vmem:[%s3676_s1 + $0x20] sm:$0xff] }
  0x1a   :  { %2535 = vmatpush3.msra.mxu0 %v3115_v12  ;;  %2547 = vmatprep.subr.mxu1 %v2994_v0 }
  0x1b   :  { %2536 = vmatprep.subr.mxu0 %v2994_v0  ;;  %2563 = vmatprep.mubr.msk.f32.mxu1 %vm2995_vm0, %v2994_v0  ;;  %v215_v17 = vld [vmem:[#allocation2] sm:$0xff] }
  0x1c   :  { %2537 = vmatpush3.msra.mxu0 %v3120_v13  ;;  %2548 = vmatpush3.msra.mxu1 %v3163_v19 }
  0x1d   :  { %2538 = vmatprep.subr.mxu0 %v2994_v0  ;;  %2549 = vmatprep.subr.mxu1 %v2994_v0 }
  0x1e   :  { %2539 = vmatpush3.msra.mxu0 %v3127_v14  ;;  %2550 = vmatpush3.msra.mxu1 %v3168_v20 }
  0x1f   :  { %2540 = vmatprep.subr.mxu0 %v2994_v0  ;;  %2551 = vmatprep.subr.mxu1 %v2994_v0 }
  0x20   :  { %2541 = vmatpush3.msra.mxu0 %v3133_v15  ;;  %2552 = vmatpush3.msra.mxu1 %v3181_v21 }
  0x21   :  { %2542 = vmatprep.subr.mxu0 %v2994_v0  ;;  %2553 = vmatprep.subr.mxu1 %v2994_v0 }
  0x22   :  { %2543 = vmatpush3.msra.mxu0 %v3137_v16  ;;  %2554 = vmatpush3.msra.mxu1 %v3186_v22 }
  0x23   :  { %2545 = vmatmul.mubr.msk.f32.vlgmr.msra.gmra.mxu0 %vm133_vm2, %v215_v17  ;;  %2566 = vmatprep.subr.mxu0 %v2994_v0 }
  0x24   :  { %2567 = vmatpush3.msra.mxu0 %v3070_v2  ;;  %2574 = vmatprep.mubr.msk.f32.mxu0 %vm2995_vm0, %v2994_v0 }
  0x25   :  { %2568 = vmatprep.subr.mxu0 %v2994_v0  ;;  %2555 = vmatprep.subr.mxu1 %v2994_v0 }
  0x26   :  { %2569 = vmatpush3.msra.mxu0 %v3079_v4  ;;  %2556 = vmatpush3.msra.mxu1 %v3194_v23 }
  0x27   :  { %2570 = vmatprep.subr.mxu0 %v2994_v0  ;;  %2557 = vmatprep.subr.mxu1 %v2994_v0 }
  0x28   :  { %2571 = vmatpush3.msra.mxu0 %v3087_v6  ;;  %2558 = vmatpush3.msra.mxu1 %v3203_v24 }
  0x29   :  { %2572 = vmatprep.subr.mxu0 %v2994_v0  ;;  %2559 = vmatprep.subr.mxu1 %v2994_v0 }
  0x2a   :  { %2573 = vmatpush3.msra.mxu0 %v3098_v8  ;;  %2560 = vmatpush3.msra.mxu1 %v3212_v25 }
  0x2b   :  { %2575 = vmatmul.mubr.msk.f32.vlgmr.msra.gmra.mxu0 %vm140_vm3, %v2291_v18  ;;  %2596 = vmatprep.subr.mxu0 %v2994_v0 }
  0x2c   :  { %2612 = vmatprep.mubr.msk.f32.mxu0 %vm2995_vm0, %v2994_v0  ;;  %2597 = vmatpush3.msra.mxu0 %v3163_v19 }
  0x2d   :  { %2598 = vmatprep.subr.mxu0 %v2994_v0  ;;  %2561 = vmatprep.subr.mxu1 %v2994_v0 }
  0x2e   :  { %2599 = vmatpush3.msra.mxu0 %v3168_v20  ;;  %2562 = vmatpush3.msra.mxu1 %v3225_v26 }
  0x2f   :  { %2600 = vmatprep.subr.mxu0 %v2994_v0  ;;  %2577 = vmatprep.subr.mxu1 %v2994_v0 }
  0x30   :  { %2601 = vmatpush3.msra.mxu0 %v3181_v21 }
  0x31   :  { %2602 = vmatprep.subr.mxu0 %v2994_v0 }
  0x32   :  { %2603 = vmatpush3.msra.mxu0 %v3186_v22 }
  0x33   :  { %2604 = vmatprep.subr.mxu0 %v2994_v0 }
  0x34   :  { %2605 = vmatpush3.msra.mxu0 %v3194_v23 }
  0x35   :  { %2606 = vmatprep.subr.mxu0 %v2994_v0 }
  0x36   :  { %2607 = vmatpush3.msra.mxu0 %v3203_v24 }
  0x37   :  { %2608 = vmatprep.subr.mxu0 %v2994_v0 }
  0x38   :  { %2609 = vmatpush3.msra.mxu0 %v3212_v25 }
  0x39   :  { %2610 = vmatprep.subr.mxu0 %v2994_v0 }
  0x3a   :  { %2611 = vmatpush3.msra.mxu0 %v3225_v26 }
  0x3b   :  { %2626 = vmatprep.subr.mxu0 %v2994_v0 }
  0xd2   :  { %v128_v27 = vpop.f32.mrf.mxu0 }
  0xd3   :  { %v3235_v32 = vadd.f32 %v2285_v31, %v128_v27 }
  0xd4   :  { %v2516_v28 = vpop.f32.mrf.mxu0 }
  0xd8   :  { %v210_v29 = vpop.f32.mrf.mxu1 }
  0xd9   :  { %v214_v33 = vadd.f32 %v210_v29, %v3235_v32 }
  0xda   :  { %v2527_v30 = vpop.f32.mrf.mxu1 }
  0xe3   :  { %v293_v34 = vpop.f32.mrf.mxu0 }
  0xe4   :  { %v297_v35 = vadd.f32 %v293_v34, %v214_v33 }
  0xe5   :  { %v2546_v36 = vpop.f32.mrf.mxu0 }
  0xe6   :  { %399 = vst.msk [vmem:[#allocation2] sm:$0xff] %vm133_vm2, %v297_v35  ;;  %2564 = vmatmul.mubr.msk.f32.vlgmr.msra.gmra.mxu1 %vm133_vm2, %v297_v35  ;;  %v2311_v35 = vld [vmem:[%s3676_s1 + $0x28] sm:$0xff] }
  0xe7   :  { %2578 = vmatpush3.msra.mxu1 %v3081_v5  ;;  %2593 = vmatprep.mubr.msk.f32.mxu1 %vm2995_vm0, %v2994_v0 }
  0xe8   :  { %2579 = vmatprep.subr.mxu1 %v2994_v0 }
  0xe9   :  { %2580 = vmatpush3.msra.mxu1 %v3091_v7 }
  0xea   :  { %2581 = vmatprep.subr.mxu1 %v2994_v0 }
  0xeb   :  { %2582 = vmatpush3.msra.mxu1 %v3102_v9  ;;  %v475_v37 = vpop.f32.mrf.mxu0 }
  0xec   :  { %2583 = vmatprep.subr.mxu1 %v2994_v0  ;;  %v479_v46 = vadd.f32 %v475_v37, %v3235_v32 }
  0xed   :  { %2584 = vmatpush3.msra.mxu1 %v3115_v12  ;;  %v2576_v38 = vpop.f32.mrf.mxu0  ;;  %v480_v39 = vld [vmem:[#allocation2] sm:$0xff] }
  0xee   :  { %2585 = vmatprep.subr.mxu1 %v2994_v0 }
  0xef   :  { %2586 = vmatpush3.msra.mxu1 %v3120_v13 }
  0xf0   :  { %2587 = vmatprep.subr.mxu1 %v2994_v0 }
  0xf1   :  { %2588 = vmatpush3.msra.mxu1 %v3127_v14 }
  0xf2   :  { %2589 = vmatprep.subr.mxu1 %v2994_v0 }
  0xf3   :  { %2590 = vmatpush3.msra.mxu1 %v3133_v15 }
  0xf4   :  { %2591 = vmatprep.subr.mxu1 %v2994_v0 }
  0xf5   :  { %2592 = vmatpush3.msra.mxu1 %v3137_v16 }
  0xf6   :  { %2594 = vmatmul.mubr.msk.f32.vlgmr.msra.gmra.mxu1 %vm133_vm2, %v480_v39  ;;  %2615 = vmatprep.subr.mxu1 %v2994_v0 }
  0xf7   :  { %2616 = vmatpush3.msra.mxu1 %v3070_v2  ;;  %2623 = vmatprep.mubr.msk.f32.mxu1 %vm2995_vm0, %v2994_v0 }
  0xf8   :  { %2617 = vmatprep.subr.mxu1 %v2994_v0 }
  0xf9   :  { %2618 = vmatpush3.msra.mxu1 %v3079_v4 }
  0xfa   :  { %2619 = vmatprep.subr.mxu1 %v2994_v0 }
  0xfb   :  { %2620 = vmatpush3.msra.mxu1 %v3087_v6 }
  0xfc   :  { %2621 = vmatprep.subr.mxu1 %v2994_v0 }
  0xfd   :  { %2622 = vmatpush3.msra.mxu1 %v3098_v8 }
  0xfe   :  { %2624 = vmatmul.mubr.msk.f32.vlgmr.msra.gmra.mxu1 %vm140_vm3, %v2296_v40  ;;  %2645 = vmatprep.subr.mxu1 %v2994_v0 }
  0xff   :  { %2646 = vmatpush3.msra.mxu1 %v3163_v19  ;;  %2661 = vmatprep.mubr.msk.f32.mxu1 %vm2995_vm0, %v2994_v0 }
 0x100   :  { %2647 = vmatprep.subr.mxu1 %v2994_v0 }
 0x101   :  { %2648 = vmatpush3.msra.mxu1 %v3168_v20 }
 0x102   :  { %2649 = vmatprep.subr.mxu1 %v2994_v0 }
 0x103   :  { %2650 = vmatpush3.msra.mxu1 %v3181_v21 }
 0x104   :  { %2651 = vmatprep.subr.mxu1 %v2994_v0 }
 0x105   :  { %2652 = vmatpush3.msra.mxu1 %v3186_v22 }
 0x106   :  { %2653 = vmatprep.subr.mxu1 %v2994_v0 }
 0x107   :  { %2654 = vmatpush3.msra.mxu1 %v3194_v23 }
 0x108   :  { %2655 = vmatprep.subr.mxu1 %v2994_v0 }
 0x109   :  { %2656 = vmatpush3.msra.mxu1 %v3203_v24 }
 0x10a   :  { %2657 = vmatprep.subr.mxu1 %v2994_v0 }
 0x10b   :  { %2658 = vmatpush3.msra.mxu1 %v3212_v25 }
 0x10c   :  { %2659 = vmatprep.subr.mxu1 %v2994_v0 }
 0x10d   :  { %2660 = vmatpush3.msra.mxu1 %v3225_v26 }
 0x10e   :  { %2675 = vmatprep.subr.mxu1 %v2994_v0 }
 0x1a6   :  { %v382_v42 = vpop.f32.mrf.mxu1 }
 0x1a7   :  { %v3297_v43 = vadd.f32 %v3294_v41, %v382_v42 }
 0x1a8   :  { %v2565_v44 = vpop.f32.mrf.mxu1 }
 0x1a9   :  { %v386_v45 = vsel %vm140_vm3, %v3297_v43, -inf }
 0x1aa   :  { %387 = vmax.xlane.f32.xlu0 %v386_v45 }
 0x1b6   :  { %v558_v47 = vpop.f32.mrf.mxu1 }
 0x1b7   :  { %v562_v48 = vadd.f32 %v558_v47, %v479_v46 }
 0x1b8   :  { %v2595_v49 = vpop.f32.mrf.mxu1 }
 0x1b9   :  { %665 = vst.msk [vmem:[#allocation2] sm:$0xff] %vm133_vm2, %v562_v48  ;;  %2613 = vmatmul.mubr.msk.f32.vlgmr.msra.gmra.mxu0 %vm133_vm2, %v562_v48  ;;  %v2316_v48 = vld [vmem:[%s3676_s1 + $0x30] sm:$0xff] }
 0x1ba   :  { %2627 = vmatpush3.msra.mxu0 %v3081_v5  ;;  %2642 = vmatprep.mubr.msk.f32.mxu0 %vm2995_vm0, %v2994_v0 }
 0x1bb   :  { %2628 = vmatprep.subr.mxu0 %v2994_v0 }
 0x1bc   :  { %2629 = vmatpush3.msra.mxu0 %v3091_v7 }
 0x1bd   :  { %2630 = vmatprep.subr.mxu0 %v2994_v0 }
 0x1be   :  { %2631 = vmatpush3.msra.mxu0 %v3102_v9  ;;  %v741_v50 = vpop.f32.mrf.mxu1 }
 0x1bf   :  { %2632 = vmatprep.subr.mxu0 %v2994_v0  ;;  %v745_v58 = vadd.f32 %v741_v50, %v3235_v32 }
 0x1c0   :  { %2633 = vmatpush3.msra.mxu0 %v3115_v12  ;;  %v2625_v51 = vpop.f32.mrf.mxu1  ;;  %v746_v52 = vld [vmem:[#allocation2] sm:$0xff] }
 0x1c1   :  { %2634 = vmatprep.subr.mxu0 %v2994_v0 }
 0x1c2   :  { %2635 = vmatpush3.msra.mxu0 %v3120_v13 }
 0x1c3   :  { %2636 = vmatprep.subr.mxu0 %v2994_v0 }
 0x1c4   :  { %2637 = vmatpush3.msra.mxu0 %v3127_v14 }
 0x1c5   :  { %2638 = vmatprep.subr.mxu0 %v2994_v0 }
 0x1c6   :  { %2639 = vmatpush3.msra.mxu0 %v3133_v15 }
 0x1c7   :  { %2640 = vmatprep.subr.mxu0 %v2994_v0 }
 0x1c8   :  { %2641 = vmatpush3.msra.mxu0 %v3137_v16 }
 0x1c9   :  { %2643 = vmatmul.mubr.msk.f32.vlgmr.msra.gmra.mxu0 %vm133_vm2, %v746_v52  ;;  %2664 = vmatprep.subr.mxu0 %v2994_v0 }
 0x1ca   :  { %2665 = vmatpush3.msra.mxu0 %v3070_v2  ;;  %2672 = vmatprep.mubr.msk.f32.mxu0 %vm2995_vm0, %v2994_v0 }
 0x1cb   :  { %2666 = vmatprep.subr.mxu0 %v2994_v0 }
 0x1cc   :  { %2667 = vmatpush3.msra.mxu0 %v3079_v4 }
 0x1cd   :  { %2668 = vmatprep.subr.mxu0 %v2994_v0 }
 0x1ce   :  { %2669 = vmatpush3.msra.mxu0 %v3087_v6 }
 0x1cf   :  { %2670 = vmatprep.subr.mxu0 %v2994_v0 }
 0x1d0   :  { %2671 = vmatpush3.msra.mxu0 %v3098_v8 }
 0x1d1   :  { %2673 = vmatmul.mubr.msk.f32.vlgmr.msra.gmra.mxu0 %vm140_vm3, %v2301_v53  ;;  %2694 = vmatprep.subr.mxu0 %v2994_v0 }
 0x1d2   :  { %2695 = vmatpush3.msra.mxu0 %v3163_v19  ;;  %2710 = vmatprep.mubr.msk.f32.mxu0 %vm2995_vm0, %v2994_v0 }
 0x1d3   :  { %2696 = vmatprep.subr.mxu0 %v2994_v0 }
 0x1d4   :  { %2697 = vmatpush3.msra.mxu0 %v3168_v20 }
 0x1d5   :  { %2698 = vmatprep.subr.mxu0 %v2994_v0 }
 0x1d6   :  { %2699 = vmatpush3.msra.mxu0 %v3181_v21 }
 0x1d7   :  { %2700 = vmatprep.subr.mxu0 %v2994_v0 }
 0x1d8   :  { %2701 = vmatpush3.msra.mxu0 %v3186_v22 }
 0x1d9   :  { %2702 = vmatprep.subr.mxu0 %v2994_v0 }
 0x1da   :  { %2703 = vmatpush3.msra.mxu0 %v3194_v23 }
 0x1db   :  { %2704 = vmatprep.subr.mxu0 %v2994_v0 }
 0x1dc   :  { %2705 = vmatpush3.msra.mxu0 %v3203_v24 }
 0x1dd   :  { %2706 = vmatprep.subr.mxu0 %v2994_v0 }
 0x1de   :  { %2707 = vmatpush3.msra.mxu0 %v3212_v25 }
 0x1df   :  { %2708 = vmatprep.subr.mxu0 %v2994_v0 }
 0x1e0   :  { %2709 = vmatpush3.msra.mxu0 %v3225_v26 }
 0x1e1   :  { %2724 = vmatprep.subr.mxu0 %v2994_v0 }
 0x279   :  { %v647_v54 = vpop.f32.mrf.mxu0 }
 0x27a   :  { %v3356_v55 = vadd.f32 %v3294_v41, %v647_v54 }
 0x27b   :  { %v2614_v56 = vpop.f32.mrf.mxu0 }
 0x27c   :  { %v651_v57 = vsel %vm140_vm3, %v3356_v55, -inf  ;;  %v2083_v56 = vld [vmem:[#allocation3 + $0x30] sm:$0xff] }
 0x27d   :  { %652 = vmax.xlane.f32.xlu0 %v651_v57  ;;  %v2082_v57 = vld [vmem:[#allocation3 + $0x28] sm:$0xff] }
 0x289   :  { %v824_v59 = vpop.f32.mrf.mxu0 }
 0x28a   :  { %v828_v60 = vadd.f32 %v824_v59, %v745_v58  ;;  %v2081_v58 = vld [vmem:[#allocation3 + $0x20] sm:$0xff] }
 0x28b   :  { %v2644_v61 = vpop.f32.mrf.mxu0 }
 0x28c   :  { %931 = vst.msk [vmem:[#allocation2] sm:$0xff] %vm133_vm2, %v828_v60  ;;  %2662 = vmatmul.mubr.msk.f32.vlgmr.msra.gmra.mxu1 %vm133_vm2, %v828_v60  ;;  %v2080_v60 = vld [vmem:[#allocation3 + $0x18] sm:$0xff] }
 0x28d   :  { %2676 = vmatpush3.msra.mxu1 %v3081_v5  ;;  %2691 = vmatprep.mubr.msk.f32.mxu1 %vm2995_vm0, %v2994_v0 }
 0x28e   :  { %2677 = vmatprep.subr.mxu1 %v2994_v0 }
 0x28f   :  { %2678 = vmatpush3.msra.mxu1 %v3091_v7 }
 0x290   :  { %2679 = vmatprep.subr.mxu1 %v2994_v0 }
 0x291   :  { %2680 = vmatpush3.msra.mxu1 %v3102_v9  ;;  %v1007_v62 = vpop.f32.mrf.mxu0 }
 0x292   :  { %2681 = vmatprep.subr.mxu1 %v2994_v0  ;;  %v1011_v27 = vadd.f32 %v1007_v62, %v3235_v32  ;;  %v2079_v62 = vld [vmem:[#allocation3 + $0x10] sm:$0xff] }
 0x293   :  { %2682 = vmatpush3.msra.mxu1 %v3115_v12  ;;  %v2674_v63 = vpop.f32.mrf.mxu0  ;;  %v1012_v1 = vld [vmem:[#allocation2] sm:$0xff] }
 0x294   :  { %2683 = vmatprep.subr.mxu1 %v2994_v0  ;;  %v2078_v63 = vld [vmem:[#allocation3 + $0x8] sm:$0xff] }
 0x295   :  { %2684 = vmatpush3.msra.mxu1 %v3120_v13 }
 0x296   :  { %2685 = vmatprep.subr.mxu1 %v2994_v0 }
 0x297   :  { %2686 = vmatpush3.msra.mxu1 %v3127_v14 }
 0x298   :  { %2687 = vmatprep.subr.mxu1 %v2994_v0 }
 0x299   :  { %2688 = vmatpush3.msra.mxu1 %v3133_v15 }
 0x29a   :  { %2689 = vmatprep.subr.mxu1 %v2994_v0 }
 0x29b   :  { %2690 = vmatpush3.msra.mxu1 %v3137_v16 }
 0x29c   :  { %2692 = vmatmul.mubr.msk.f32.vlgmr.msra.gmra.mxu1 %vm133_vm2, %v1012_v1  ;;  %2713 = vmatprep.subr.mxu1 %v2994_v0  ;;  %v2077_v1 = vld [vmem:[#allocation3] sm:$0xff] }
 0x29d   :  { %2714 = vmatpush3.msra.mxu1 %v3070_v2  ;;  %2721 = vmatprep.mubr.msk.f32.mxu1 %vm2995_vm0, %v2994_v0 }
 0x29e   :  { %2715 = vmatprep.subr.mxu1 %v2994_v0 }
 0x29f   :  { %2716 = vmatpush3.msra.mxu1 %v3079_v4 }
 0x2a0   :  { %2717 = vmatprep.subr.mxu1 %v2994_v0 }
 0x2a1   :  { %2718 = vmatpush3.msra.mxu1 %v3087_v6 }
 0x2a2   :  { %2719 = vmatprep.subr.mxu1 %v2994_v0 }
 0x2a3   :  { %2720 = vmatpush3.msra.mxu1 %v3098_v8 }
 0x2a4   :  { %2722 = vmatmul.mubr.msk.f32.vlgmr.msra.gmra.mxu1 %vm140_vm3, %v2306_v3  ;;  %2743 = vmatprep.subr.mxu1 %v2994_v0 }
 0x2a5   :  { %2744 = vmatpush3.msra.mxu1 %v3163_v19  ;;  %2759 = vmatprep.mubr.msk.f32.mxu1 %vm2995_vm0, %v2994_v0 }
 0x2a6   :  { %2745 = vmatprep.subr.mxu1 %v2994_v0 }
 0x2a7   :  { %2746 = vmatpush3.msra.mxu1 %v3168_v20 }
 0x2a8   :  { %2747 = vmatprep.subr.mxu1 %v2994_v0 }
 0x2a9   :  { %2748 = vmatpush3.msra.mxu1 %v3181_v21 }
 0x2aa   :  { %2749 = vmatprep.subr.mxu1 %v2994_v0 }
 0x2ab   :  { %2750 = vmatpush3.msra.mxu1 %v3186_v22 }
 0x2ac   :  { %2751 = vmatprep.subr.mxu1 %v2994_v0 }
 0x2ad   :  { %2752 = vmatpush3.msra.mxu1 %v3194_v23 }
 0x2ae   :  { %2753 = vmatprep.subr.mxu1 %v2994_v0 }
 0x2af   :  { %2754 = vmatpush3.msra.mxu1 %v3203_v24 }
 0x2b0   :  { %2755 = vmatprep.subr.mxu1 %v2994_v0 }
 0x2b1   :  { %2756 = vmatpush3.msra.mxu1 %v3212_v25 }
 0x2b2   :  { %2757 = vmatprep.subr.mxu1 %v2994_v0 }
 0x2b3   :  { %2758 = vmatpush3.msra.mxu1 %v3225_v26 }
 0x2b4   :  { %2773 = vmatprep.subr.mxu1 %v2994_v0 }
 0x34c   :  { %v913_v10 = vpop.f32.mrf.mxu1 }
 0x34d   :  { %v3415_v11 = vadd.f32 %v3294_v41, %v913_v10  ;;  %v2166_v10 = vld [vmem:[%s3682_s7 + $0x38] sm:$0xff] }
 0x34e   :  { %v2663_v17 = vpop.f32.mrf.mxu1 }
 0x34f   :  { %v917_v18 = vsel %vm140_vm3, %v3415_v11, -inf  ;;  %v2165_v17 = vld [vmem:[%s3682_s7 + $0x30] sm:$0xff] }
 0x350   :  { %918 = vmax.xlane.f32.xlu1 %v917_v18  ;;  %v2164_v18 = vld [vmem:[%s3682_s7 + $0x28] sm:$0xff] }
 0x35c   :  { %v1090_v28 = vpop.f32.mrf.mxu1 }
 0x35d   :  { %v1094_v29 = vadd.f32 %v1090_v28, %v1011_v27  ;;  %v2163_v27 = vld [vmem:[%s3682_s7 + $0x20] sm:$0xff]  ;;  %v2162_v28 = vld [vmem:[%s3682_s7 + $0x18] sm:$0xff] }
 0x35e   :  { %v2693_v30 = vpop.f32.mrf.mxu1 }
 0x35f   :  { %1197 = vst.msk [vmem:[#allocation2] sm:$0xff] %vm133_vm2, %v1094_v29  ;;  %2711 = vmatmul.mubr.msk.f32.vlgmr.msra.gmra.mxu0 %vm133_vm2, %v1094_v29  ;;  %v2161_v29 = vld [vmem:[%s3682_s7 + $0x10] sm:$0xff]  ;;  %v2160_v30 = vld [vmem:[%s3682_s7 + $0x8] sm:$0xff] }
 0x360   :  { %2725 = vmatpush3.msra.mxu0 %v3081_v5  ;;  %2740 = vmatprep.mubr.msk.f32.mxu0 %vm2995_vm0, %v2994_v0 }
 0x361   :  { %2726 = vmatprep.subr.mxu0 %v2994_v0 }
 0x362   :  { %2727 = vmatpush3.msra.mxu0 %v3091_v7 }
 0x363   :  { %2728 = vmatprep.subr.mxu0 %v2994_v0 }
 0x364   :  { %2729 = vmatpush3.msra.mxu0 %v3102_v9  ;;  %v1273_v31 = vpop.f32.mrf.mxu1 }
 0x365   :  { %2730 = vmatprep.subr.mxu0 %v2994_v0  ;;  %v1277_v40 = vadd.f32 %v1273_v31, %v3235_v32  ;;  %v2159_v31 = vld [vmem:[%s3682_s7] sm:$0xff] }
 0x366   :  { %2731 = vmatpush3.msra.mxu0 %v3115_v12  ;;  %v2723_v33 = vpop.f32.mrf.mxu1  ;;  %v1278_v34 = vld [vmem:[#allocation2] sm:$0xff] }
 0x367   :  { %2732 = vmatprep.subr.mxu0 %v2994_v0  ;;  %v388_v33 = vpop.xlane.xlu0 %387 }
 0x368   :  { %2733 = vmatpush3.msra.mxu0 %v3120_v13 }
 0x369   :  { %2734 = vmatprep.subr.mxu0 %v2994_v0 }
 0x36a   :  { %2735 = vmatpush3.msra.mxu0 %v3127_v14 }
 0x36b   :  { %2736 = vmatprep.subr.mxu0 %v2994_v0 }
 0x36c   :  { %2737 = vmatpush3.msra.mxu0 %v3133_v15 }
 0x36d   :  { %2738 = vmatprep.subr.mxu0 %v2994_v0 }
 0x36e   :  { %2739 = vmatpush3.msra.mxu0 %v3137_v16 }
 0x36f   :  { %2741 = vmatmul.mubr.msk.f32.vlgmr.msra.gmra.mxu0 %vm133_vm2, %v1278_v34  ;;  %2762 = vmatprep.subr.mxu0 %v2994_v0  ;;  %v389_v34 = vsub.f32 %v3297_v43, %v388_v33 }
 0x370   :  { %2763 = vmatpush3.msra.mxu0 %v3070_v2  ;;  %2770 = vmatprep.mubr.msk.f32.mxu0 %vm2995_vm0, %v2994_v0 }
 0x371   :  { %2764 = vmatprep.subr.mxu0 %v2994_v0 }
 0x372   :  { %2765 = vmatpush3.msra.mxu0 %v3079_v4 }
 0x373   :  { %2766 = vmatprep.subr.mxu0 %v2994_v0 }
 0x374   :  { %2767 = vmatpush3.msra.mxu0 %v3087_v6 }
 0x375   :  { %2768 = vmatprep.subr.mxu0 %v2994_v0 }
 0x376   :  { %2769 = vmatpush3.msra.mxu0 %v3098_v8 }
 0x377   :  { %2771 = vmatmul.mubr.msk.f32.vlgmr.msra.gmra.mxu0 %vm140_vm3, %v2311_v35  ;;  %2792 = vmatprep.subr.mxu0 %v2994_v0  ;;  %v653_v35 = vpop.xlane.xlu0 %652 }
 0x378   :  { %2793 = vmatpush3.msra.mxu0 %v3163_v19  ;;  %2808 = vmatprep.mubr.msk.f32.mxu0 %vm2995_vm0, %v2994_v0 }
 0x379   :  { %2794 = vmatprep.subr.mxu0 %v2994_v0 }
 0x37a   :  { %2795 = vmatpush3.msra.mxu0 %v3168_v20 }
 0x37b   :  { %2796 = vmatprep.subr.mxu0 %v2994_v0 }
 0x37c   :  { %2797 = vmatpush3.msra.mxu0 %v3181_v21 }
 0x37d   :  { %2798 = vmatprep.subr.mxu0 %v2994_v0 }
 0x37e   :  { %2799 = vmatpush3.msra.mxu0 %v3186_v22 }
 0x37f   :  { %2800 = vmatprep.subr.mxu0 %v2994_v0 }
 0x380   :  { %2801 = vmatpush3.msra.mxu0 %v3194_v23 }
 0x381   :  { %2802 = vmatprep.subr.mxu0 %v2994_v0 }
 0x382   :  { %2803 = vmatpush3.msra.mxu0 %v3203_v24 }
 0x383   :  { %2804 = vmatprep.subr.mxu0 %v2994_v0 }
 0x384   :  { %2805 = vmatpush3.msra.mxu0 %v3212_v25 }
 0x385   :  { %2806 = vmatprep.subr.mxu0 %v2994_v0 }
 0x386   :  { %2807 = vmatpush3.msra.mxu0 %v3225_v26 }
 0x387   :  { %2822 = vmatprep.subr.mxu0 %v2994_v0 }
 0x41f   :  { %v1179_v36 = vpop.f32.mrf.mxu0 }
 0x420   :  { %v3474_v37 = vadd.f32 %v3294_v41, %v1179_v36  ;;  %v919_v36 = vpop.xlane.xlu1 %918 }
 0x421   :  { %v2712_v38 = vpop.f32.mrf.mxu0 }
 0x422   :  { %v1183_v39 = vsel %vm140_vm3, %v3474_v37, -inf  ;;  %v390_v38 = vmul.f32 1.442695, %v389_v34 }
 0x423   :  { %1184 = vmax.xlane.f32.xlu1 %v1183_v39  ;;  %v920_v39 = vsub.f32 %v3415_v11, %v919_v36 }
 0x424   :  { %2915 = vpow2.f32 %v390_v38 }
 0x42f   :  { %v1356_v42 = vpop.f32.mrf.mxu0 }
 0x430   :  { %v1360_v44 = vadd.f32 %v1356_v42, %v1277_v40  ;;  %v921_v42 = vmul.f32 1.442695, %v920_v39 }
 0x431   :  { %v2742_v45 = vpop.f32.mrf.mxu0  ;;  %v2916_v43 = vpop.eup %2915 }
 0x432   :  { %1463 = vst.msk [vmem:[#allocation2] sm:$0xff] %vm133_vm2, %v1360_v44  ;;  %2760 = vmatmul.mubr.msk.f32.vlgmr.msra.gmra.mxu1 %vm133_vm2, %v1360_v44  ;;  %2917 = vpow2.f32 %v921_v42 }
 0x433   :  { %2774 = vmatpush3.msra.mxu1 %v3081_v5  ;;  %2789 = vmatprep.mubr.msk.f32.mxu1 %vm2995_vm0, %v2994_v0 }
 0x434   :  { %2775 = vmatprep.subr.mxu1 %v2994_v0 }
 0x435   :  { %2776 = vmatpush3.msra.mxu1 %v3091_v7 }
 0x436   :  { %2777 = vmatprep.subr.mxu1 %v2994_v0 }
 0x437   :  { %2778 = vmatpush3.msra.mxu1 %v3102_v9  ;;  %v1539_v46 = vpop.f32.mrf.mxu0 }
 0x438   :  { %2779 = vmatprep.subr.mxu1 %v2994_v0 }
 0x439   :  { %2780 = vmatpush3.msra.mxu1 %v3115_v12  ;;  %v2772_v47 = vpop.f32.mrf.mxu0  ;;  %v1544_v5 = vld [vmem:[#allocation2] sm:$0xff] }
 0x43a   :  { %2781 = vmatprep.subr.mxu1 %v2994_v0 }
 0x43b   :  { %2782 = vmatpush3.msra.mxu1 %v3120_v13 }
 0x43c   :  { %2783 = vmatprep.subr.mxu1 %v2994_v0 }
 0x43d   :  { %2784 = vmatpush3.msra.mxu1 %v3127_v14 }
 0x43e   :  { %2785 = vmatprep.subr.mxu1 %v2994_v0 }
 0x43f   :  { %2786 = vmatpush3.msra.mxu1 %v3133_v15 }
 0x440   :  { %2787 = vmatprep.subr.mxu1 %v2994_v0 }
 0x441   :  { %2788 = vmatpush3.msra.mxu1 %v3137_v16 }
 0x442   :  { %2790 = vmatmul.mubr.msk.f32.vlgmr.msra.gmra.mxu1 %vm133_vm2, %v1544_v5  ;;  %2811 = vmatprep.subr.mxu1 %v2994_v0 }
 0x443   :  { %2812 = vmatpush3.msra.mxu1 %v3070_v2  ;;  %2819 = vmatprep.mubr.msk.f32.mxu1 %vm2995_vm0, %v2994_v0 }
 0x444   :  { %2813 = vmatprep.subr.mxu1 %v2994_v0 }
 0x445   :  { %2814 = vmatpush3.msra.mxu1 %v3079_v4 }
 0x446   :  { %2815 = vmatprep.subr.mxu1 %v2994_v0 }
 0x447   :  { %2816 = vmatpush3.msra.mxu1 %v3087_v6 }
 0x448   :  { %2817 = vmatprep.subr.mxu1 %v2994_v0 }
 0x449   :  { %2818 = vmatpush3.msra.mxu1 %v3098_v8 }
 0x44a   :  { %2820 = vmatmul.mubr.msk.f32.vlgmr.msra.gmra.mxu1 %vm140_vm3, %v2316_v48  ;;  %2841 = vmatprep.subr.mxu1 %v2994_v0  ;;  %v392_v48 = vsel %vm140_vm3, %v2916_v43, 0.0 }
 0x44b   :  { %2842 = vmatpush3.msra.mxu1 %v3163_v19  ;;  %2857 = vmatprep.mubr.msk.f32.mxu1 %vm2995_vm0, %v2994_v0  ;;  %v1543_v19 = vadd.f32 %v1539_v46, %v3235_v32 }
 0x44c   :  { %2843 = vmatprep.subr.mxu1 %v2994_v0 }
 0x44d   :  { %2844 = vmatpush3.msra.mxu1 %v3168_v20 }
 0x44e   :  { %2845 = vmatprep.subr.mxu1 %v2994_v0 }
 0x44f   :  { %2846 = vmatpush3.msra.mxu1 %v3181_v21 }
 0x450   :  { %2847 = vmatprep.subr.mxu1 %v2994_v0 }
 0x451   :  { %2848 = vmatpush3.msra.mxu1 %v3186_v22  ;;  %v1818_v22 = vld [vmem:[#allocation3 + $0x38] sm:$0xff] }
 0x452   :  { %2849 = vmatprep.subr.mxu1 %v2994_v0 }
 0x453   :  { %2850 = vmatpush3.msra.mxu1 %v3194_v23 }
 0x454   :  { %2851 = vmatprep.subr.mxu1 %v2994_v0 }
 0x455   :  { %2852 = vmatpush3.msra.mxu1 %v3203_v24 }
 0x456   :  { %2853 = vmatprep.subr.mxu1 %v2994_v0 }
 0x457   :  { %2854 = vmatpush3.msra.mxu1 %v3212_v25 }
 0x458   :  { %2855 = vmatprep.subr.mxu1 %v2994_v0 }
 0x459   :  { %2856 = vmatpush3.msra.mxu1 %v3225_v26 }
 0x45a   :  { %2871 = vmatprep.subr.mxu1 %v2994_v0 }
 0x4f2   :  { %v1445_v2 = vpop.f32.mrf.mxu1 }
 0x4f3   :  { %v3533_v4 = vadd.f32 %v3294_v41, %v1445_v2  ;;  %v2918_v2 = vpop.eup %2917 }
 0x4f4   :  { %v2761_v6 = vpop.f32.mrf.mxu1  ;;  %v923_v11 = vsel %vm140_vm3, %v2918_v2, 0.0 }
 0x4f5   :  { %v1449_v8 = vsel %vm140_vm3, %v3533_v4, -inf }
 0x4f6   :  { %1450 = vmax.xlane.f32.xlu0 %v1449_v8 }
 0x502   :  { %v1622_v20 = vpop.f32.mrf.mxu1 }
 0x503   :  { %v1626_v21 = vadd.f32 %v1622_v20, %v1543_v19 }
 0x504   :  { %v2791_v23 = vpop.f32.mrf.mxu1 }
 0x505   :  { %1729 = vst.msk [vmem:[#allocation2] sm:$0xff] %vm133_vm2, %v1626_v21  ;;  %2809 = vmatmul.mubr.msk.f32.vlgmr.msra.gmra.mxu0 %vm133_vm2, %v1626_v21 }
 0x506   :  { %2823 = vmatpush3.msra.mxu0 %v1818_v22  ;;  %2838 = vmatprep.mubr.msk.f32.mxu0 %vm2995_vm0, %v2994_v0 }
 0x507   :  { %2824 = vmatprep.subr.mxu0 %v2994_v0 }
 0x508   :  { %2825 = vmatpush3.msra.mxu0 %v3091_v7  ;;  %v2001_v7 = vld [vmem:[%s3679_s4 + $0x18] sm:$0xff] }
 0x509   :  { %2826 = vmatprep.subr.mxu0 %v2994_v0 }
 0x50a   :  { %2827 = vmatpush3.msra.mxu0 %v3102_v9  ;;  %v1805_v24 = vpop.f32.mrf.mxu1 }
 0x50b   :  { %2828 = vmatprep.subr.mxu0 %v2994_v0  ;;  %v1809_v51 = vadd.f32 %v1805_v24, %v3235_v32 }
 0x50c   :  { %2829 = vmatpush3.msra.mxu0 %v3115_v12  ;;  %v2821_v25 = vpop.f32.mrf.mxu1  ;;  %v1810_v9 = vld [vmem:[#allocation2] sm:$0xff]  ;;  %v2000_v12 = vld [vmem:[%s3679_s4 + $0x10] sm:$0xff] }
 0x50d   :  { %2830 = vmatprep.subr.mxu0 %v2994_v0 }
 0x50e   :  { %2831 = vmatpush3.msra.mxu0 %v3120_v13  ;;  %v1999_v13 = vld [vmem:[%s3679_s4 + $0x8] sm:$0xff] }
 0x50f   :  { %2832 = vmatprep.subr.mxu0 %v2994_v0 }
 0x510   :  { %2833 = vmatpush3.msra.mxu0 %v3127_v14  ;;  %v1998_v14 = vld [vmem:[%s3679_s4] sm:$0xff] }
 0x511   :  { %2834 = vmatprep.subr.mxu0 %v2994_v0 }
 0x512   :  { %2835 = vmatpush3.msra.mxu0 %v3133_v15  ;;  %v2321_v15 = vld [vmem:[%s3676_s1 + $0x38] sm:$0xff] }
 0x513   :  { %2836 = vmatprep.subr.mxu0 %v2994_v0 }
 0x514   :  { %2837 = vmatpush3.msra.mxu0 %v3137_v16 }
 0x515   :  { %2839 = vmatmul.mubr.msk.f32.vlgmr.msra.gmra.mxu0 %vm133_vm2, %v1810_v9  ;;  %2860 = vmatprep.subr.mxu0 %v2994_v0 }
 0x516   :  { %2861 = vmatpush3.msra.mxu0 %v2001_v7  ;;  %2868 = vmatprep.mubr.msk.f32.mxu0 %vm2995_vm0, %v2994_v0 }
 0x517   :  { %2862 = vmatprep.subr.mxu0 %v2994_v0 }
 0x518   :  { %2863 = vmatpush3.msra.mxu0 %v2000_v12 }
 0x519   :  { %2864 = vmatprep.subr.mxu0 %v2994_v0 }
 0x51a   :  { %2865 = vmatpush3.msra.mxu0 %v1999_v13 }
 0x51b   :  { %2866 = vmatprep.subr.mxu0 %v2994_v0 }
 0x51c   :  { %2867 = vmatpush3.msra.mxu0 %v1998_v14 }
 0x51d   :  { %2869 = vmatmul.mubr.msk.f32.vlgmr.msra.gmra.mxu0 %vm140_vm3, %v2321_v15  ;;  %2890 = vmatprep.subr.mxu0 %v2994_v0 }
 0x51e   :  { %2906 = vmatprep.mubr.msk.f32.mxu0 %vm2995_vm0, %v2994_v0  ;;  %2891 = vmatpush3.msra.mxu0 %v2166_v10 }
 0x51f   :  { %2892 = vmatprep.subr.mxu0 %v2994_v0 }
 0x520   :  { %2893 = vmatpush3.msra.mxu0 %v2165_v17 }
 0x521   :  { %2894 = vmatprep.subr.mxu0 %v2994_v0 }
 0x522   :  { %2895 = vmatpush3.msra.mxu0 %v2164_v18 }
 0x523   :  { %2896 = vmatprep.subr.mxu0 %v2994_v0 }
 0x524   :  { %2897 = vmatpush3.msra.mxu0 %v2163_v27 }
 0x525   :  { %2898 = vmatprep.subr.mxu0 %v2994_v0 }
 0x526   :  { %2899 = vmatpush3.msra.mxu0 %v2162_v28 }
 0x527   :  { %2900 = vmatprep.subr.mxu0 %v2994_v0 }
 0x528   :  { %2901 = vmatpush3.msra.mxu0 %v2161_v29 }
 0x529   :  { %2902 = vmatprep.subr.mxu0 %v2994_v0 }
 0x52a   :  { %2903 = vmatpush3.msra.mxu0 %v2160_v30 }
 0x52b   :  { %2904 = vmatprep.subr.mxu0 %v2994_v0 }
 0x52c   :  { %2905 = vmatpush3.msra.mxu0 %v2159_v31 }
 0x57f   :  { %v1451_v40 = vpop.xlane.xlu0 %1450 }
 0x580   :  { %v1452_v44 = vsub.f32 %v3533_v4, %v1451_v40 }
 0x5c5   :  { %v1711_v16 = vpop.f32.mrf.mxu0 }
 0x5c6   :  { %v3583_v26 = vadd.f32 %v3294_v41, %v1711_v16 }
 0x5c7   :  { %v2810_v49 = vpop.f32.mrf.mxu0 }
 0x5c8   :  { %v1715_v50 = vsel %vm140_vm3, %v3583_v26, -inf }
 0x5c9   :  { %1716 = vmax.xlane.f32.xlu1 %v1715_v50 }
 0x5d5   :  { %v1888_v52 = vpop.f32.mrf.mxu0 }
 0x5d6   :  { %v1892_v53 = vadd.f32 %v1888_v52, %v1809_v51 }
 0x5d7   :  { %v2840_v54 = vpop.f32.mrf.mxu0 }
 0x5d8   :  { %1995 = vst.msk [vmem:[#allocation2] sm:$0xff] %vm133_vm2, %v1892_v53  ;;  %2858 = vmatmul.mubr.msk.f32.vlgmr.msra.gmra.mxu1 %vm133_vm2, %v1892_v53  ;;  %v654_v54 = vsub.f32 %v3356_v55, %v653_v35 }
 0x5d9   :  { %2872 = vmatpush3.msra.mxu1 %v1818_v22  ;;  %2887 = vmatprep.mubr.msk.f32.mxu1 %vm2995_vm0, %v2994_v0 }
 0x5da   :  { %2873 = vmatprep.subr.mxu1 %v2994_v0 }
 0x5db   :  { %2874 = vmatpush3.msra.mxu1 %v2083_v56  ;;  %v1185_v56 = vpop.xlane.xlu1 %1184 }
 0x5dc   :  { %2875 = vmatprep.subr.mxu1 %v2994_v0 }
 0x5dd   :  { %2876 = vmatpush3.msra.mxu1 %v2082_v57  ;;  %v3594_v59 = vpop.f32.mrf.mxu0  ;;  %v655_v57 = vmul.f32 1.442695, %v654_v54 }
 0x5de   :  { %2877 = vmatprep.subr.mxu1 %v2994_v0  ;;  %v2075_v4 = vadd.f32 %v3594_v59, %v3235_v32 }
 0x5df   :  { %2878 = vmatpush3.msra.mxu1 %v2081_v58  ;;  %v2870_v61 = vpop.f32.mrf.mxu0  ;;  %v2076_v3 = vld [vmem:[#allocation2] sm:$0xff]  ;;  %v1186_v58 = vsub.f32 %v3474_v37, %v1185_v56 }
 0x5e0   :  { %2879 = vmatprep.subr.mxu1 %v2994_v0 }
 0x5e1   :  { %2880 = vmatpush3.msra.mxu1 %v2080_v60  ;;  %v1187_v60 = vmul.f32 1.442695, %v1186_v58 }
 0x5e2   :  { %2881 = vmatprep.subr.mxu1 %v2994_v0 }
 0x5e3   :  { %2882 = vmatpush3.msra.mxu1 %v2079_v62 }
 0x5e4   :  { %2883 = vmatprep.subr.mxu1 %v2994_v0 }
 0x5e5   :  { %2884 = vmatpush3.msra.mxu1 %v2078_v63  ;;  %v2324_v63 = vld [vmem:[%s3683_s8] ss:$0 sm:$0xff]  ;;  %s2996_s8 = smov [#allocation6]  }
 0x5e6   :  { %2885 = vmatprep.subr.mxu1 %v2994_v0  ;;  %v1453_v0 = vmul.f32 1.442695, %v1452_v44  ;;  %s2269_s25 = sshll.u32 %s2996_s8, 4  ;;  %s2270_s25 = int_to_ptr.vmem [resolvable:$true] %s2269_s25 }
 0x5e7   :  { %2886 = vmatpush3.msra.mxu1 %v2077_v1  ;;  %s2967_s26 = scalar_lea.vmem %s2270_s25, 1024  ;;  %p2972_p6 = scmp.lt.s32.totalorder %s2270_s25, %s2270_s25 }
 0x5e8   :  { %2888 = vmatmul.mubr.msk.f32.vlgmr.msra.gmra.mxu1 %vm133_vm2, %v2076_v3  ;;  %2919 = vpow2.f32 %v1453_v0  ;;  %p2968_p5 = scmp.ne.s32.totalorder %s2270_s25, %s2967_s26  ;;  %p2973_p7 = scmp.lt.s32.totalorder %s2967_s26, %s2967_s26 }
 0x5ea   :  { %p2974_p8 = por %p2973_p7, %p2972_p6 }
 0x5ec   :  { %p2975_p9 = pnand %p2974_p8, %p2968_p5 }
 0x5f5   :  { %v2920_v6 = vpop.eup %2919 }
 0x5f6   :  { %v1455_v8 = vsel %vm140_vm3, %v2920_v6, 0.0 }
 0x652   :  { %v1717_v59 = vpop.xlane.xlu1 %1716 }
 0x653   :  { %v1718_v61 = vsub.f32 %v3583_v26, %v1717_v59 }
 0x655   :  { %v1719_v62 = vmul.f32 1.442695, %v1718_v61 }
 0x698   :  { %v1977_v45 = vpop.f32.mrf.mxu1 }
 0x699   :  { %v1978_v46 = vadd.f32 %v3294_v41, %v1977_v45 }
 0x69a   :  { %v2859_v47 = vpop.f32.mrf.mxu1 }
 0x69b   :  { %v1981_v5 = vsel %vm140_vm3, %v1978_v46, -inf }
 0x69c   :  { %1982 = vmax.xlane.f32.xlu0 %v1981_v5 }
 0x6a0   :  { %393 = vadd.xlane.f32.xlu0 %v392_v48 }
 0x6a4   :  { %924 = vadd.xlane.f32.xlu0 %v923_v11 }
 0x6a8   :  { %v2154_v19 = vpop.f32.mrf.mxu1  ;;  %1456 = vadd.xlane.f32.xlu0 %v1455_v8 }
 0x6a9   :  { %v2158_v41 = vadd.f32 %v2154_v19, %v2075_v4 }
 0x6aa   :  { %v2889_v20 = vpop.f32.mrf.mxu1 }
 0x6ab   :  { %2261 = vst.msk [vmem:[#allocation2] sm:$0xff] %vm133_vm2, %v2158_v41  ;;  %2907 = vmatmul.mubr.msk.f32.vlgmr.msra.gmra.mxu0 %vm133_vm2, %v2158_v41 }
 0x6b2   :  { %v2262_v21 = vld [vmem:[#allocation2] sm:$0xff] }
 0x6b3   :  { %2263 = vst.msk [vmem:[%s3685_s10] sm:$0xff] %vm133_vm2, %v2262_v21 }
 0x725   :  { %v1983_v22 = vpop.xlane.xlu0 %1982 }
 0x726   :  { %v1984_v23 = vsub.f32 %v1978_v46, %v1983_v22 }
 0x728   :  { %v1985_v24 = vmul.f32 1.442695, %v1984_v23 }
 0x729   :  { %v394_v32 = vpop.xlane.xlu0 %393 }
 0x72a   :  { %2921 = vpow2.f32 %v1985_v24 }
 0x72b   :  { %2923 = vlog2.f32 %v394_v32 }
 0x72d   :  { %v925_v25 = vpop.xlane.xlu0 %924 }
 0x72e   :  { %2925 = vlog2.f32 %v925_v25 }
 0x731   :  { %v1457_v7 = vpop.xlane.xlu0 %1456 }
 0x732   :  { %2927 = vlog2.f32 %v1457_v7 }
 0x733   :  { %2929 = vpow2.f32 %v655_v57 }
 0x734   :  { %2931 = vpow2.f32 %v1187_v60 }
 0x735   :  { %2933 = vpow2.f32 %v1719_v62 }
 0x737   :  { %v2922_v9 = vpop.eup %2921 }
 0x738   :  { %v2924_v12 = vpop.eup %2923  ;;  %v1987_v13 = vsel %vm140_vm3, %v2922_v9, 0.0 }
 0x739   :  { %v396_v14 = vmul.f32 0.6931472, %v2924_v12  ;;  %1988 = vadd.xlane.f32.xlu0 %v1987_v13 }
 0x73b   :  { %v2926_v15 = vpop.eup %2925  ;;  %v397_v16 = vsub.f32 %v389_v34, %v396_v14 }
 0x73c   :  { %v927_v49 = vmul.f32 0.6931472, %v2926_v15 }
 0x73d   :  { %398 = vst.msk [vmem:[#allocation6] sm:$0xff] %vm140_vm3, %v397_v16 }
 0x73e   :  { %v928_v50 = vsub.f32 %v920_v39, %v927_v49 }
 0x73f   :  { %v2928_v51 = vpop.eup %2927 }
 0x740   :  { %930 = vst.msk [vmem:[#allocation6 + $0x10] sm:$0xff] %vm140_vm3, %v928_v50  ;;  %v1459_v52 = vmul.f32 0.6931472, %v2928_v51  ;;  %v2930_v17 = vpop.eup %2929 }
 0x741   :  { %v657_v37 = vsel %vm140_vm3, %v2930_v17, 0.0  ;;  %v2932_v18 = vpop.eup %2931 }
 0x742   :  { %v1460_v53 = vsub.f32 %v1452_v44, %v1459_v52  ;;  %v1189_v26 = vsel %vm140_vm3, %v2932_v18, 0.0  ;;  %v2934_v27 = vpop.eup %2933 }
 0x743   :  { %v1721_v28 = vsel %vm140_vm3, %v2934_v27, 0.0 }
 0x744   :  { %1462 = vst.msk [vmem:[#allocation6 + $0x20] sm:$0xff] %vm140_vm3, %v1460_v53 }
 0x76b   :  { %v2243_v1 = vpop.f32.mrf.mxu0 }
 0x76c   :  { %v2244_v3 = vadd.f32 %v2324_v63, %v2243_v1 }
 0x76d   :  { %v2908_v10 = vpop.f32.mrf.mxu0 }
 0x76e   :  { %v2247_v55 = vsel %vm140_vm3, %v2244_v3, -inf }
 0x76f   :  { %2248 = vmax.xlane.f32.xlu1 %v2247_v55 }
 0x773   :  { %658 = vadd.xlane.f32.xlu1 %v657_v37 }
 0x777   :  { %1190 = vadd.xlane.f32.xlu1 %v1189_v26 }
 0x77b   :  { %1722 = vadd.xlane.f32.xlu1 %v1721_v28 }
 0x7c2   :  { %v1989_v29 = vpop.xlane.xlu0 %1988 }
 0x7c3   :  { %2935 = vlog2.f32 %v1989_v29 }
 0x7d0   :  { %v2936_v30 = vpop.eup %2935 }
 0x7d1   :  { %v1991_v31 = vmul.f32 0.6931472, %v2936_v30 }
 0x7d3   :  { %v1992_v33 = vsub.f32 %v1984_v23, %v1991_v31 }
 0x7d5   :  { %1994 = vst.msk [vmem:[#allocation6 + $0x30] sm:$0xff] %vm140_vm3, %v1992_v33 }
 0x7f8   :  { %v2249_v34 = vpop.xlane.xlu1 %2248 }
 0x7f9   :  { %v2250_v35 = vsub.f32 %v2244_v3, %v2249_v34 }
 0x7fb   :  { %v2251_v36 = vmul.f32 1.442695, %v2250_v35 }
 0x7fc   :  { %v659_v38 = vpop.xlane.xlu1 %658 }
 0x7fd   :  { %2937 = vpow2.f32 %v2251_v36 }
 0x7fe   :  { %2939 = vlog2.f32 %v659_v38 }
 0x800   :  { %v1191_v39 = vpop.xlane.xlu1 %1190 }
 0x801   :  { %2941 = vlog2.f32 %v1191_v39 }
 0x804   :  { %v1723_v40 = vpop.xlane.xlu1 %1722 }
 0x805   :  { %2943 = vlog2.f32 %v1723_v40 }
 0x80a   :  { %v2938_v42 = vpop.eup %2937 }
 0x80b   :  { %v2940_v44 = vpop.eup %2939  ;;  %v2253_v0 = vsel %vm140_vm3, %v2938_v42, 0.0 }
 0x80c   :  { %v661_v45 = vmul.f32 0.6931472, %v2940_v44  ;;  %2254 = vadd.xlane.f32.xlu1 %v2253_v0 }
 0x80e   :  { %v2942_v46 = vpop.eup %2941  ;;  %v662_v47 = vsub.f32 %v654_v54, %v661_v45 }
 0x80f   :  { %v1193_v5 = vmul.f32 0.6931472, %v2942_v46 }
 0x810   :  { %664 = vst.msk [vmem:[#allocation6 + $0x8] sm:$0xff] %vm140_vm3, %v662_v47 }
 0x811   :  { %v1194_v43 = vsub.f32 %v1186_v58, %v1193_v5 }
 0x812   :  { %v2944_v48 = vpop.eup %2943 }
 0x813   :  { %1196 = vst.msk [vmem:[#allocation6 + $0x18] sm:$0xff] %vm140_vm3, %v1194_v43  ;;  %v1725_v2 = vmul.f32 0.6931472, %v2944_v48 }
 0x815   :  { %v1726_v11 = vsub.f32 %v1718_v61, %v1725_v2 }
 0x817   :  { %1728 = vst.msk [vmem:[#allocation6 + $0x28] sm:$0xff] %vm140_vm3, %v1726_v11 }
 0x895   :  { %v2255_v6 = vpop.xlane.xlu1 %2254 }
 0x896   :  { %2945 = vlog2.f32 %v2255_v6 }
 0x8a3   :  { %v2946_v4 = vpop.eup %2945 }
 0x8a4   :  { %v2257_v8 = vmul.f32 0.6931472, %v2946_v4 }
 0x8a6   :  { %v2258_v19 = vsub.f32 %v2250_v35, %v2257_v8 }
 0x8a8   :  { %2260 = vst.msk [vmem:[#allocation6 + $0x38] sm:$0xff] %vm140_vm3, %v2258_v19 }
 0x8a9   :  { %2978 = shalt.err (!%p2975_p9)
}
 0x8aa   :  { %2275 = dma.vmem_to_hbm [thread:$0]  %s2270_s25, 1024, %s3684_s9, [#allocation5], %s2992_s16, %s2992_s16, %s2993_s17  }
 0x8ab   :  { %2989 = dma.done.wait [#allocation5], 1024  }
 0x8ac   :  { %2990 = vsyncadd [#allocation5], 4294966272 }
 0x8ad   :  { %2283 = vsyncpa [#allocation4], 1 }
 0x8ae   :  { %2284 = vsyncpa [#allocation5], 1 }

</bundles_post_ra>
